<compile_context>
chip_gen: v6e
topology: v6e:2x2x1
jax: 0.10.0
libtpu: 0.0.40
codegen_flags: <defaults>
</compile_context>

<pallas_src>
import numpy as np
import jax
import jax.numpy as jnp
from jax import lax
from jax.experimental import pallas as pl
from jax.experimental.pallas import tpu as pltpu


# ----------------------------------------------------------------------------
# Bilinear (align_corners=True) 1-D interpolation matrix.
# ----------------------------------------------------------------------------
def _interp_matrix_np(out_size, in_size):
    m = np.zeros((out_size, in_size), dtype=np.float32)
    if out_size == 1:
        coords = np.zeros((1,), dtype=np.float64)
    else:
        coords = np.arange(out_size, dtype=np.float64) * (in_size - 1) / (out_size - 1)
    i0 = np.clip(np.floor(coords).astype(np.int64), 0, in_size - 1)
    i1 = np.minimum(i0 + 1, in_size - 1)
    w1 = (coords - i0).astype(np.float32)
    w0 = 1.0 - w1
    for o in range(out_size):
        m[o, i0[o]] += w0[o]
        m[o, i1[o]] += w1[o]
    return m


# ----------------------------------------------------------------------------
# Fused kernel over ALL branches.  Activations are 2-D slabs (N*H, C*W).
# ----------------------------------------------------------------------------
def _make_fused_kernel(metas):
    n_in = sum(7 if m["has_last"] else 5 for m in metas)

    def kernel(*refs):
        in_refs, out_refs = refs[:n_in], refs[n_in:]
        idx = 0
        last = None
        for bi, m in enumerate(metas):
            H, W, cin, cout, has_last = m["H"], m["W"], m["cin"], m["cout"], m["has_last"]
            Lc = cin * W

            skip_ref = in_refs[idx]
            idx += 1
            if has_last:
                awt_ref = in_refs[idx]
                ah_ref = in_refs[idx + 1]
                idx += 2
            taps_ref, dwb_ref, pwm_ref, pwb_ref = in_refs[idx:idx + 4]
            idx += 4

            s = skip_ref[...].astype(jnp.float32)              # (N*H, cin*W)

            if has_last:
                # Separable bilinear upsample of `last` (kept in VMEM/vregs,
                # never re-read from HBM), batched over (N, cin) via
                # block-diagonal interpolation matrices: 2 matmuls total.
                t = jnp.dot(last, awt_ref[...],
                            preferred_element_type=jnp.float32)   # (N*Hp, cin*W)
                up = jnp.dot(ah_ref[...], t,
                             preferred_element_type=jnp.float32)  # (N*H,  cin*W)
                s = s + up

            # --- depthwise 3x3 conv + folded BN ------------------------------
            # Zero padding via roll + masks; the same masks also stop leakage
            # across batch images (rows) and channels (lanes).
            R = s.shape[0]
            row = lax.broadcasted_iota(jnp.int32, (R, Lc), 0) % H
            col = lax.broadcasted_iota(jnp.int32, (R, Lc), 1) % W

            d = jnp.zeros((R, Lc), jnp.float32)
            k = 0
            for dh in (-1, 0, 1):
                if dh == 0:
                    rh = s
                else:
                    rh = pltpu.roll(s, shift=(-dh) % R, axis=0)      # sublane roll
                    mh = (row >= 1) if dh == -1 else (row <= H - 2)
                    rh = jnp.where(mh, rh, 0.0)
                for dw in (-1, 0, 1):
                    if dw == 0:
                        rw = rh
                    else:
                        rw = pltpu.roll(rh, shift=(-dw) % Lc, axis=1)  # lane roll
                        mw = (col >= 1) if dw == -1 else (col <= W - 2)
                        rw = jnp.where(mw, rw, 0.0)
                    d = d + rw * taps_ref[k]                # (1, cin*W) VMEM row
                    k += 1
            d = d + dwb_ref[...]                            # folded BN bias

            # --- pointwise 1x1 conv + folded BN + ReLU: one matmul ------------
            o = jnp.dot(d, pwm_ref[...], preferred_element_type=jnp.float32)
            o = jnp.maximum(o + pwb_ref[...], 0.0)          # (N*H, cout*W)

            out_refs[bi][...] = o.astype(out_refs[bi].dtype)  # one lane-dense store
            last = o

    return kernel


# ----------------------------------------------------------------------------
# Module: parameters + forward
# ----------------------------------------------------------------------------
class IterativeAggregatorPallas:
    def __init__(self, in_channels, key):
        self.in_channels_rev = in_channels[::-1]
        n = len(in_channels)
        eps = 1e-5
        self.params = []
        for i in range(n):
            cin = self.in_channels_rev[i]
            cout = self.in_channels_rev[i + 1] if i != n - 1 else self.in_channels_rev[i]
            key, *ks = jax.random.split(key, 11)
            # depthwise 3x3 conv (no bias) + BN (eval, folded)
            dw_w = 0.2 * jax.random.normal(ks[0], (cin, 3, 3), jnp.float32)
            dw_gamma = 1.0 + 0.1 * jax.random.normal(ks[1], (cin,), jnp.float32)
            dw_beta = 0.1 * jax.random.normal(ks[2], (cin,), jnp.float32)
            dw_mean = 0.1 * jax.random.normal(ks[3], (cin,), jnp.float32)
            dw_var = jax.random.uniform(ks[4], (cin,), jnp.float32, 0.5, 1.5)
            dw_scale = dw_gamma / jnp.sqrt(dw_var + eps)
            dw_bias = dw_beta - dw_mean * dw_scale
            # pointwise 1x1 conv (no bias) + BN (eval, folded) + ReLU
            pw_w = jax.random.normal(ks[5], (cout, cin), jnp.float32) / np.sqrt(cin)
            pw_gamma = 1.0 + 0.1 * jax.random.normal(ks[6], (cout,), jnp.float32)
            pw_beta = 0.1 * jax.random.normal(ks[7], (cout,), jnp.float32)
            pw_mean = 0.1 * jax.random.normal(ks[8], (cout,), jnp.float32)
            pw_var = jax.random.uniform(ks[9], (cout,), jnp.float32, 0.5, 1.5)
            pw_scale = pw_gamma / jnp.sqrt(pw_var + eps)
            pw_w_eff = pw_w * pw_scale[:, None]
            pw_b_eff = pw_beta - pw_mean * pw_scale
            self.params.append(dict(
                dw_w=dw_w, dw_scale=dw_scale, dw_bias=dw_bias,
                pw_w=pw_w_eff, pw_b=pw_b_eff,
            ))

    # ---- Pallas forward: one fused pallas_call for the whole aggregator ----
    def forward(self, xs_nchw):
        xs = list(xs_nchw)[::-1]              # low-res -> high-res
        N = int(xs[0].shape[0])

        args, metas, out_shapes, out_nchw = [], [], [], []
        prev_hw = None
        for i, s in enumerate(xs):
            p = self.params[i]
            _, cin, H, W = s.shape
            cout = int(p["pw_b"].shape[0])
            has_last = i > 0

            # skip in merged 2-D layout: (N, C, H, W) -> (N*H, C*W)
            s2 = jnp.transpose(s, (0, 2, 1, 3)).reshape(N * H, cin * W)
            args.append(s2)

            if has_last:
                Hp, Wp = prev_hw
                awt = _interp_matrix_np(W, Wp).T                       # (Wp, W)
                awt_bd = np.kron(np.eye(cin, dtype=np.float32), awt)   # (cin*Wp, cin*W)
                ah = _interp_matrix_np(H, Hp)                          # (H, Hp)
                ah_bd = np.kron(np.eye(N, dtype=np.float32), ah)       # (N*H, N*Hp)
                args += [jnp.asarray(awt_bd), jnp.asarray(ah_bd)]

            # depthwise taps with folded BN scale, expanded to lanes (c*W + w)
            dw_w = np.asarray(p["dw_w"])
            dw_scale = np.asarray(p["dw_scale"])
            dw_bias = np.asarray(p["dw_bias"])
            taps = np.empty((9, 1, cin * W), np.float32)
            k = 0
            for kh in range(3):
                for kw in range(3):
                    taps[k, 0, :] = np.repeat(dw_w[:, kh, kw] * dw_scale, W)
                    k += 1
            dwb_row = np.repeat(dw_bias, W)[None, :].astype(np.float32)

            # pointwise 1x1 as one lane-mixing matrix: kron(pw^T, I_W)
            pw = np.asarray(p["pw_w"])                                 # (cout, cin)
            P = np.kron(pw.T.astype(np.float32),
                        np.eye(W, dtype=np.float32))                   # (cin*W, cout*W)
            pwb_row = np.repeat(np.asarray(p["pw_b"]), W)[None, :].astype(np.float32)

            args += [jnp.asarray(taps), jnp.asarray(dwb_row),
                     jnp.asarray(P), jnp.asarray(pwb_row)]

            metas.append(dict(H=H, W=W, cin=cin, cout=cout, has_last=has_last))
            out_shapes.append(jax.ShapeDtypeStruct((N * H, cout * W), s.dtype))
            out_nchw.append((N, cout, H, W))
            prev_hw = (H, W)

        kernel = _make_fused_kernel(metas)
        outs = pl.pallas_call(
            kernel,
            out_shape=tuple(out_shapes),
        )(*args)

        # (N*H, C*W) -> NCHW
        y_list = []
        for o2, (n_, c_, h_, w_) in zip(outs, out_nchw):
            y_list.append(jnp.transpose(o2.reshape(n_, h_, c_, w_), (0, 2, 1, 3)))
        return y_list[::-1]                   # back to high-res -> low-res

    # ---- pure-JAX reference (same math, no Pallas), for a sanity check ----
    def forward_reference(self, xs_nchw):
        hi = lax.Precision.HIGHEST
        xs = list(xs_nchw)[::-1]
        y_list, last = [], None
        for i, s in enumerate(xs):
            p = self.params[i]
            N, C, H, W = s.shape
            if last is not None:
                _, _, Hp, Wp = last.shape
                A = jnp.asarray(_interp_matrix_np(H, Hp))
                B = jnp.asarray(_interp_matrix_np(W, Wp))
                up = jnp.einsum("oh,nchw->ncow", A, last, precision=hi)
                up = jnp.einsum("pw,ncow->ncop", B, up, precision=hi)
                s = s + up
            xp = jnp.pad(s, ((0, 0), (0, 0), (1, 1), (1, 1)))
            acc = jnp.zeros_like(s)
            for kh in range(3):
                for kw in range(3):
                    acc = acc + xp[:, :, kh:kh + H, kw:kw + W] * \
                        p["dw_w"][:, kh, kw][None, :, None, None]
            s = acc * p["dw_scale"][None, :, None, None] + p["dw_bias"][None, :, None, None]
            s = jnp.einsum("nchw,dc->ndhw", s, p["pw_w"], precision=hi) \
                + p["pw_b"][None, :, None, None]
            s = jnp.maximum(s, 0.0)
            last = s
            y_list.append(s)
        return y_list[::-1]


# ----------------------------------------------------------------------------
if __name__ == "__main__":
    key = jax.random.PRNGKey(0)
    in_channels = [4, 8, 16]          # per-branch channels (high-res -> low-res)
    spatial = [16, 8, 4]              # per-branch spatial sizes
    N = 2
    keys = jax.random.split(key, len(in_channels) + 1)
    xs = [jax.random.normal(keys[i], (N, c, s, s), dtype=jnp.float32)
          for i, (c, s) in enumerate(zip(in_channels, spatial))]

    agg = IterativeAggregatorPallas(in_channels, keys[-1])
    ys = agg.forward(xs)
    ys = jax.block_until_ready(ys)

    refs = agg.forward_reference(xs)
    for y, r in zip(ys, refs):
        assert y.shape == r.shape
        np.testing.assert_allclose(np.asarray(y), np.asarray(r), rtol=2e-4, atol=2e-4)

    print("KERNEL_OK")
</pallas_src>

<mosaic_0001>
module attributes {stable_mosaic.version = 11 : i64} {
  func.func @kernel(%arg0: memref<8x64xf32, #tpu.memory_space<vmem>>, %arg1: memref<9x1x64xf32, #tpu.memory_space<vmem>>, %arg2: memref<1x64xf32, #tpu.memory_space<vmem>>, %arg3: memref<64x32xf32, #tpu.memory_space<vmem>>, %arg4: memref<1x32xf32, #tpu.memory_space<vmem>>, %arg5: memref<16x64xf32, #tpu.memory_space<vmem>>, %arg6: memref<32x64xf32, #tpu.memory_space<vmem>>, %arg7: memref<16x8xf32, #tpu.memory_space<vmem>>, %arg8: memref<9x1x64xf32, #tpu.memory_space<vmem>>, %arg9: memref<1x64xf32, #tpu.memory_space<vmem>>, %arg10: memref<64x32xf32, #tpu.memory_space<vmem>>, %arg11: memref<1x32xf32, #tpu.memory_space<vmem>>, %arg12: memref<32x64xf32, #tpu.memory_space<vmem>>, %arg13: memref<32x64xf32, #tpu.memory_space<vmem>>, %arg14: memref<32x16xf32, #tpu.memory_space<vmem>>, %arg15: memref<9x1x64xf32, #tpu.memory_space<vmem>>, %arg16: memref<1x64xf32, #tpu.memory_space<vmem>>, %arg17: memref<64x64xf32, #tpu.memory_space<vmem>>, %arg18: memref<1x64xf32, #tpu.memory_space<vmem>>, %arg19: memref<8x32xf32, #tpu.memory_space<vmem>>, %arg20: memref<16x32xf32, #tpu.memory_space<vmem>>, %arg21: memref<32x64xf32, #tpu.memory_space<vmem>>) attributes {dimension_semantics = [], scalar_prefetch = 0 : i64, scratch_operands = 0 : i64, tpu.core_type = #tpu.core_type<tc>} {
    %c0 = arith.constant 0 : index
    %c0_0 = arith.constant 0 : index
    %0 = vector.load %arg0[%c0, %c0_0] : memref<8x64xf32, #tpu.memory_space<vmem>>, vector<8x64xf32>
    %1 = tpu.iota {dimensions = array<i32: 0>} : vector<8x64xi32>
    %c4_i32 = arith.constant 4 : i32
    %c0_i32 = arith.constant 0 : i32
    %2 = arith.cmpi eq, %c4_i32, %c0_i32 : i32
    %c1_i32 = arith.constant 1 : i32
    %3 = arith.select %2, %c1_i32, %c4_i32 : i32
    %4 = vector.broadcast %3 : i32 to vector<8x64xi32>
    %5 = arith.remsi %1, %4 : vector<8x64xi32>
    %c0_i32_1 = arith.constant 0 : i32
    %6 = vector.broadcast %c0_i32_1 : i32 to vector<8x64xi32>
    %7 = arith.cmpi ne, %5, %6 : vector<8x64xi32>
    %c0_i32_2 = arith.constant 0 : i32
    %8 = vector.broadcast %c0_i32_2 : i32 to vector<8x64xi32>
    %9 = arith.cmpi slt, %5, %8 : vector<8x64xi32>
    %c0_i32_3 = arith.constant 0 : i32
    %10 = arith.cmpi slt, %3, %c0_i32_3 : i32
    %11 = vector.broadcast %10 : i1 to vector<8x64xi1>
    %12 = vector.broadcast %11 : vector<8x64xi1> to vector<8x64xi1>
    %13 = arith.xori %9, %12 : vector<8x64xi1>
    %14 = arith.andi %13, %7 : vector<8x64xi1>
    %15 = vector.broadcast %3 : i32 to vector<8x64xi32>
    %16 = arith.addi %5, %15 : vector<8x64xi32>
    %17 = arith.select %14, %16, %5 : vector<8x64xi1>, vector<8x64xi32>
    %18 = tpu.iota {dimensions = array<i32: 1>} : vector<8x64xi32>
    %c4_i32_4 = arith.constant 4 : i32
    %c0_i32_5 = arith.constant 0 : i32
    %19 = arith.cmpi eq, %c4_i32_4, %c0_i32_5 : i32
    %c1_i32_6 = arith.constant 1 : i32
    %20 = arith.select %19, %c1_i32_6, %c4_i32_4 : i32
    %21 = vector.broadcast %20 : i32 to vector<8x64xi32>
    %22 = arith.remsi %18, %21 : vector<8x64xi32>
    %c0_i32_7 = arith.constant 0 : i32
    %23 = vector.broadcast %c0_i32_7 : i32 to vector<8x64xi32>
    %24 = arith.cmpi ne, %22, %23 : vector<8x64xi32>
    %c0_i32_8 = arith.constant 0 : i32
    %25 = vector.broadcast %c0_i32_8 : i32 to vector<8x64xi32>
    %26 = arith.cmpi slt, %22, %25 : vector<8x64xi32>
    %c0_i32_9 = arith.constant 0 : i32
    %27 = arith.cmpi slt, %20, %c0_i32_9 : i32
    %28 = vector.broadcast %27 : i1 to vector<8x64xi1>
    %29 = vector.broadcast %28 : vector<8x64xi1> to vector<8x64xi1>
    %30 = arith.xori %26, %29 : vector<8x64xi1>
    %31 = arith.andi %30, %24 : vector<8x64xi1>
    %32 = vector.broadcast %20 : i32 to vector<8x64xi32>
    %33 = arith.addi %22, %32 : vector<8x64xi32>
    %34 = arith.select %31, %33, %22 : vector<8x64xi1>, vector<8x64xi32>
    %cst = arith.constant 0.000000e+00 : f32
    %35 = vector.broadcast %cst : f32 to vector<8x64xf32>
    %c1_i32_10 = arith.constant 1 : i32
    %36 = tpu.dynamic_rotate %0 by %c1_i32_10 dim 0 : vector<8x64xf32>, i32 -> vector<8x64xf32>
    %c1_i32_11 = arith.constant 1 : i32
    %37 = vector.broadcast %c1_i32_11 : i32 to vector<8x64xi32>
    %38 = arith.cmpi sge, %17, %37 : vector<8x64xi32>
    %cst_12 = arith.constant 0.000000e+00 : f32
    %39 = vector.broadcast %cst_12 : f32 to vector<8x64xf32>
    %40 = arith.select %38, %36, %39 : vector<8x64xi1>, vector<8x64xf32>
    %c1_i32_13 = arith.constant 1 : i32
    %41 = tpu.dynamic_rotate %40 by %c1_i32_13 dim 1 : vector<8x64xf32>, i32 -> vector<8x64xf32>
    %c1_i32_14 = arith.constant 1 : i32
    %42 = vector.broadcast %c1_i32_14 : i32 to vector<8x64xi32>
    %43 = arith.cmpi sge, %34, %42 : vector<8x64xi32>
    %cst_15 = arith.constant 0.000000e+00 : f32
    %44 = vector.broadcast %cst_15 : f32 to vector<8x64xf32>
    %45 = arith.select %43, %41, %44 : vector<8x64xi1>, vector<8x64xf32>
    %c0_16 = arith.constant 0 : index
    %c0_17 = arith.constant 0 : index
    %c0_18 = arith.constant 0 : index
    %46 = vector.load %arg1[%c0_16, %c0_17, %c0_18] : memref<9x1x64xf32, #tpu.memory_space<vmem>>, vector<1x1x64xf32>
    %47 = vector.shape_cast %46 : vector<1x1x64xf32> to vector<1x64xf32>
    %48 = vector.broadcast %47 : vector<1x64xf32> to vector<8x64xf32>
    %49 = arith.mulf %45, %48 : vector<8x64xf32>
    %50 = arith.addf %35, %49 : vector<8x64xf32>
    %c1 = arith.constant 1 : index
    %c0_19 = arith.constant 0 : index
    %c0_20 = arith.constant 0 : index
    %51 = vector.load %arg1[%c1, %c0_19, %c0_20] : memref<9x1x64xf32, #tpu.memory_space<vmem>>, vector<1x1x64xf32>
    %52 = vector.shape_cast %51 : vector<1x1x64xf32> to vector<1x64xf32>
    %53 = vector.broadcast %52 : vector<1x64xf32> to vector<8x64xf32>
    %54 = arith.mulf %40, %53 : vector<8x64xf32>
    %55 = arith.addf %50, %54 : vector<8x64xf32>
    %c63_i32 = arith.constant 63 : i32
    %56 = tpu.dynamic_rotate %40 by %c63_i32 dim 1 : vector<8x64xf32>, i32 -> vector<8x64xf32>
    %c2_i32 = arith.constant 2 : i32
    %57 = vector.broadcast %c2_i32 : i32 to vector<8x64xi32>
    %58 = arith.cmpi sle, %34, %57 : vector<8x64xi32>
    %cst_21 = arith.constant 0.000000e+00 : f32
    %59 = vector.broadcast %cst_21 : f32 to vector<8x64xf32>
    %60 = arith.select %58, %56, %59 : vector<8x64xi1>, vector<8x64xf32>
    %c2 = arith.constant 2 : index
    %c0_22 = arith.constant 0 : index
    %c0_23 = arith.constant 0 : index
    %61 = vector.load %arg1[%c2, %c0_22, %c0_23] : memref<9x1x64xf32, #tpu.memory_space<vmem>>, vector<1x1x64xf32>
    %62 = vector.shape_cast %61 : vector<1x1x64xf32> to vector<1x64xf32>
    %63 = vector.broadcast %62 : vector<1x64xf32> to vector<8x64xf32>
    %64 = arith.mulf %60, %63 : vector<8x64xf32>
    %65 = arith.addf %55, %64 : vector<8x64xf32>
    %c1_i32_24 = arith.constant 1 : i32
    %66 = tpu.dynamic_rotate %0 by %c1_i32_24 dim 1 : vector<8x64xf32>, i32 -> vector<8x64xf32>
    %c1_i32_25 = arith.constant 1 : i32
    %67 = vector.broadcast %c1_i32_25 : i32 to vector<8x64xi32>
    %68 = arith.cmpi sge, %34, %67 : vector<8x64xi32>
    %cst_26 = arith.constant 0.000000e+00 : f32
    %69 = vector.broadcast %cst_26 : f32 to vector<8x64xf32>
    %70 = arith.select %68, %66, %69 : vector<8x64xi1>, vector<8x64xf32>
    %c3 = arith.constant 3 : index
    %c0_27 = arith.constant 0 : index
    %c0_28 = arith.constant 0 : index
    %71 = vector.load %arg1[%c3, %c0_27, %c0_28] : memref<9x1x64xf32, #tpu.memory_space<vmem>>, vector<1x1x64xf32>
    %72 = vector.shape_cast %71 : vector<1x1x64xf32> to vector<1x64xf32>
    %73 = vector.broadcast %72 : vector<1x64xf32> to vector<8x64xf32>
    %74 = arith.mulf %70, %73 : vector<8x64xf32>
    %75 = arith.addf %65, %74 : vector<8x64xf32>
    %c4 = arith.constant 4 : index
    %c0_29 = arith.constant 0 : index
    %c0_30 = arith.constant 0 : index
    %76 = vector.load %arg1[%c4, %c0_29, %c0_30] : memref<9x1x64xf32, #tpu.memory_space<vmem>>, vector<1x1x64xf32>
    %77 = vector.shape_cast %76 : vector<1x1x64xf32> to vector<1x64xf32>
    %78 = vector.broadcast %77 : vector<1x64xf32> to vector<8x64xf32>
    %79 = arith.mulf %0, %78 : vector<8x64xf32>
    %80 = arith.addf %75, %79 : vector<8x64xf32>
    %c63_i32_31 = arith.constant 63 : i32
    %81 = tpu.dynamic_rotate %0 by %c63_i32_31 dim 1 : vector<8x64xf32>, i32 -> vector<8x64xf32>
    %c2_i32_32 = arith.constant 2 : i32
    %82 = vector.broadcast %c2_i32_32 : i32 to vector<8x64xi32>
    %83 = arith.cmpi sle, %34, %82 : vector<8x64xi32>
    %cst_33 = arith.constant 0.000000e+00 : f32
    %84 = vector.broadcast %cst_33 : f32 to vector<8x64xf32>
    %85 = arith.select %83, %81, %84 : vector<8x64xi1>, vector<8x64xf32>
    %c5 = arith.constant 5 : index
    %c0_34 = arith.constant 0 : index
    %c0_35 = arith.constant 0 : index
    %86 = vector.load %arg1[%c5, %c0_34, %c0_35] : memref<9x1x64xf32, #tpu.memory_space<vmem>>, vector<1x1x64xf32>
    %87 = vector.shape_cast %86 : vector<1x1x64xf32> to vector<1x64xf32>
    %88 = vector.broadcast %87 : vector<1x64xf32> to vector<8x64xf32>
    %89 = arith.mulf %85, %88 : vector<8x64xf32>
    %90 = arith.addf %80, %89 : vector<8x64xf32>
    %c7_i32 = arith.constant 7 : i32
    %91 = tpu.dynamic_rotate %0 by %c7_i32 dim 0 : vector<8x64xf32>, i32 -> vector<8x64xf32>
    %c2_i32_36 = arith.constant 2 : i32
    %92 = vector.broadcast %c2_i32_36 : i32 to vector<8x64xi32>
    %93 = arith.cmpi sle, %17, %92 : vector<8x64xi32>
    %cst_37 = arith.constant 0.000000e+00 : f32
    %94 = vector.broadcast %cst_37 : f32 to vector<8x64xf32>
    %95 = arith.select %93, %91, %94 : vector<8x64xi1>, vector<8x64xf32>
    %c1_i32_38 = arith.constant 1 : i32
    %96 = tpu.dynamic_rotate %95 by %c1_i32_38 dim 1 : vector<8x64xf32>, i32 -> vector<8x64xf32>
    %c1_i32_39 = arith.constant 1 : i32
    %97 = vector.broadcast %c1_i32_39 : i32 to vector<8x64xi32>
    %98 = arith.cmpi sge, %34, %97 : vector<8x64xi32>
    %cst_40 = arith.constant 0.000000e+00 : f32
    %99 = vector.broadcast %cst_40 : f32 to vector<8x64xf32>
    %100 = arith.select %98, %96, %99 : vector<8x64xi1>, vector<8x64xf32>
    %c6 = arith.constant 6 : index
    %c0_41 = arith.constant 0 : index
    %c0_42 = arith.constant 0 : index
    %101 = vector.load %arg1[%c6, %c0_41, %c0_42] : memref<9x1x64xf32, #tpu.memory_space<vmem>>, vector<1x1x64xf32>
    %102 = vector.shape_cast %101 : vector<1x1x64xf32> to vector<1x64xf32>
    %103 = vector.broadcast %102 : vector<1x64xf32> to vector<8x64xf32>
    %104 = arith.mulf %100, %103 : vector<8x64xf32>
    %105 = arith.addf %90, %104 : vector<8x64xf32>
    %c7 = arith.constant 7 : index
    %c0_43 = arith.constant 0 : index
    %c0_44 = arith.constant 0 : index
    %106 = vector.load %arg1[%c7, %c0_43, %c0_44] : memref<9x1x64xf32, #tpu.memory_space<vmem>>, vector<1x1x64xf32>
    %107 = vector.shape_cast %106 : vector<1x1x64xf32> to vector<1x64xf32>
    %108 = vector.broadcast %107 : vector<1x64xf32> to vector<8x64xf32>
    %109 = arith.mulf %95, %108 : vector<8x64xf32>
    %110 = arith.addf %105, %109 : vector<8x64xf32>
    %c63_i32_45 = arith.constant 63 : i32
    %111 = tpu.dynamic_rotate %95 by %c63_i32_45 dim 1 : vector<8x64xf32>, i32 -> vector<8x64xf32>
    %c2_i32_46 = arith.constant 2 : i32
    %112 = vector.broadcast %c2_i32_46 : i32 to vector<8x64xi32>
    %113 = arith.cmpi sle, %34, %112 : vector<8x64xi32>
    %cst_47 = arith.constant 0.000000e+00 : f32
    %114 = vector.broadcast %cst_47 : f32 to vector<8x64xf32>
    %115 = arith.select %113, %111, %114 : vector<8x64xi1>, vector<8x64xf32>
    %c8 = arith.constant 8 : index
    %c0_48 = arith.constant 0 : index
    %c0_49 = arith.constant 0 : index
    %116 = vector.load %arg1[%c8, %c0_48, %c0_49] : memref<9x1x64xf32, #tpu.memory_space<vmem>>, vector<1x1x64xf32>
    %117 = vector.shape_cast %116 : vector<1x1x64xf32> to vector<1x64xf32>
    %118 = vector.broadcast %117 : vector<1x64xf32> to vector<8x64xf32>
    %119 = arith.mulf %115, %118 : vector<8x64xf32>
    %120 = arith.addf %110, %119 : vector<8x64xf32>
    %c0_50 = arith.constant 0 : index
    %c0_51 = arith.constant 0 : index
    %121 = vector.load %arg2[%c0_50, %c0_51] : memref<1x64xf32, #tpu.memory_space<vmem>>, vector<1x64xf32>
    %122 = vector.broadcast %121 : vector<1x64xf32> to vector<8x64xf32>
    %123 = arith.addf %120, %122 : vector<8x64xf32>
    %c0_52 = arith.constant 0 : index
    %c0_53 = arith.constant 0 : index
    %124 = vector.load %arg3[%c0_52, %c0_53] : memref<64x32xf32, #tpu.memory_space<vmem>>, vector<64x32xf32>
    %cst_54 = arith.constant dense<0.000000e+00> : vector<8x32xf32>
    %125 = tpu.matmul %123, %124, %cst_54 {dimension_numbers = #tpu.dot_dimension_numbers<[1], [0], [0], [1], [0, 0, 1, 1], [], []>} : vector<8x64xf32>, vector<64x32xf32>, vector<8x32xf32> -> vector<8x32xf32>
    %c0_55 = arith.constant 0 : index
    %c0_56 = arith.constant 0 : index
    %126 = vector.load %arg4[%c0_55, %c0_56] : memref<1x32xf32, #tpu.memory_space<vmem>>, vector<1x32xf32>
    %127 = vector.broadcast %126 : vector<1x32xf32> to vector<8x32xf32>
    %128 = arith.addf %125, %127 : vector<8x32xf32>
    %cst_57 = arith.constant 0.000000e+00 : f32
    %129 = vector.broadcast %cst_57 : f32 to vector<8x32xf32>
    %130 = arith.maximumf %128, %129 : vector<8x32xf32>
    %c0_58 = arith.constant 0 : index
    %c0_59 = arith.constant 0 : index
    %131 = vector.load %arg19[%c0_58, %c0_59] : memref<8x32xf32, #tpu.memory_space<vmem>>, vector<8x32xf32>
    tpu.vector_store %arg19[%c0_58, %c0_59], %130 {strides = array<i32>} : memref<8x32xf32, #tpu.memory_space<vmem>>, vector<8x32xf32>,
    %c0_60 = arith.constant 0 : index
    %c0_61 = arith.constant 0 : index
    %132 = vector.load %arg5[%c0_60, %c0_61] : memref<16x64xf32, #tpu.memory_space<vmem>>, vector<16x64xf32>
    %c0_62 = arith.constant 0 : index
    %c0_63 = arith.constant 0 : index
    %133 = vector.load %arg6[%c0_62, %c0_63] : memref<32x64xf32, #tpu.memory_space<vmem>>, vector<32x64xf32>
    %cst_64 = arith.constant dense<0.000000e+00> : vector<8x64xf32>
    %134 = tpu.matmul %130, %133, %cst_64 {dimension_numbers = #tpu.dot_dimension_numbers<[1], [0], [0], [1], [0, 0, 1, 1], [], []>} : vector<8x32xf32>, vector<32x64xf32>, vector<8x64xf32> -> vector<8x64xf32>
    %c0_65 = arith.constant 0 : index
    %c0_66 = arith.constant 0 : index
    %135 = vector.load %arg7[%c0_65, %c0_66] : memref<16x8xf32, #tpu.memory_space<vmem>>, vector<16x8xf32>
    %cst_67 = arith.constant dense<0.000000e+00> : vector<16x64xf32>
    %136 = tpu.matmul %135, %134, %cst_67 {dimension_numbers = #tpu.dot_dimension_numbers<[1], [0], [0], [1], [0, 0, 1, 1], [], []>} : vector<16x8xf32>, vector<8x64xf32>, vector<16x64xf32> -> vector<16x64xf32>
    %137 = arith.addf %132, %136 : vector<16x64xf32>
    %138 = tpu.iota {dimensions = array<i32: 0>} : vector<16x64xi32>
    %c8_i32 = arith.constant 8 : i32
    %c0_i32_68 = arith.constant 0 : i32
    %139 = arith.cmpi eq, %c8_i32, %c0_i32_68 : i32
    %c1_i32_69 = arith.constant 1 : i32
    %140 = arith.select %139, %c1_i32_69, %c8_i32 : i32
    %141 = vector.broadcast %140 : i32 to vector<16x64xi32>
    %142 = arith.remsi %138, %141 : vector<16x64xi32>
    %c0_i32_70 = arith.constant 0 : i32
    %143 = vector.broadcast %c0_i32_70 : i32 to vector<16x64xi32>
    %144 = arith.cmpi ne, %142, %143 : vector<16x64xi32>
    %c0_i32_71 = arith.constant 0 : i32
    %145 = vector.broadcast %c0_i32_71 : i32 to vector<16x64xi32>
    %146 = arith.cmpi slt, %142, %145 : vector<16x64xi32>
    %c0_i32_72 = arith.constant 0 : i32
    %147 = arith.cmpi slt, %140, %c0_i32_72 : i32
    %148 = vector.broadcast %147 : i1 to vector<16x64xi1>
    %149 = vector.broadcast %148 : vector<16x64xi1> to vector<16x64xi1>
    %150 = arith.xori %146, %149 : vector<16x64xi1>
    %151 = arith.andi %150, %144 : vector<16x64xi1>
    %152 = vector.broadcast %140 : i32 to vector<16x64xi32>
    %153 = arith.addi %142, %152 : vector<16x64xi32>
    %154 = arith.select %151, %153, %142 : vector<16x64xi1>, vector<16x64xi32>
    %155 = tpu.iota {dimensions = array<i32: 1>} : vector<16x64xi32>
    %c8_i32_73 = arith.constant 8 : i32
    %c0_i32_74 = arith.constant 0 : i32
    %156 = arith.cmpi eq, %c8_i32_73, %c0_i32_74 : i32
    %c1_i32_75 = arith.constant 1 : i32
    %157 = arith.select %156, %c1_i32_75, %c8_i32_73 : i32
    %158 = vector.broadcast %157 : i32 to vector<16x64xi32>
    %159 = arith.remsi %155, %158 : vector<16x64xi32>
    %c0_i32_76 = arith.constant 0 : i32
    %160 = vector.broadcast %c0_i32_76 : i32 to vector<16x64xi32>
    %161 = arith.cmpi ne, %159, %160 : vector<16x64xi32>
    %c0_i32_77 = arith.constant 0 : i32
    %162 = vector.broadcast %c0_i32_77 : i32 to vector<16x64xi32>
    %163 = arith.cmpi slt, %159, %162 : vector<16x64xi32>
    %c0_i32_78 = arith.constant 0 : i32
    %164 = arith.cmpi slt, %157, %c0_i32_78 : i32
    %165 = vector.broadcast %164 : i1 to vector<16x64xi1>
    %166 = vector.broadcast %165 : vector<16x64xi1> to vector<16x64xi1>
    %167 = arith.xori %163, %166 : vector<16x64xi1>
    %168 = arith.andi %167, %161 : vector<16x64xi1>
    %169 = vector.broadcast %157 : i32 to vector<16x64xi32>
    %170 = arith.addi %159, %169 : vector<16x64xi32>
    %171 = arith.select %168, %170, %159 : vector<16x64xi1>, vector<16x64xi32>
    %cst_79 = arith.constant 0.000000e+00 : f32
    %172 = vector.broadcast %cst_79 : f32 to vector<16x64xf32>
    %c1_i32_80 = arith.constant 1 : i32
    %173 = tpu.dynamic_rotate %137 by %c1_i32_80 dim 0 : vector<16x64xf32>, i32 -> vector<16x64xf32>
    %c1_i32_81 = arith.constant 1 : i32
    %174 = vector.broadcast %c1_i32_81 : i32 to vector<16x64xi32>
    %175 = arith.cmpi sge, %154, %174 : vector<16x64xi32>
    %cst_82 = arith.constant 0.000000e+00 : f32
    %176 = vector.broadcast %cst_82 : f32 to vector<16x64xf32>
    %177 = arith.select %175, %173, %176 : vector<16x64xi1>, vector<16x64xf32>
    %c1_i32_83 = arith.constant 1 : i32
    %178 = tpu.dynamic_rotate %177 by %c1_i32_83 dim 1 : vector<16x64xf32>, i32 -> vector<16x64xf32>
    %c1_i32_84 = arith.constant 1 : i32
    %179 = vector.broadcast %c1_i32_84 : i32 to vector<16x64xi32>
    %180 = arith.cmpi sge, %171, %179 : vector<16x64xi32>
    %cst_85 = arith.constant 0.000000e+00 : f32
    %181 = vector.broadcast %cst_85 : f32 to vector<16x64xf32>
    %182 = arith.select %180, %178, %181 : vector<16x64xi1>, vector<16x64xf32>
    %c0_86 = arith.constant 0 : index
    %c0_87 = arith.constant 0 : index
    %c0_88 = arith.constant 0 : index
    %183 = vector.load %arg8[%c0_86, %c0_87, %c0_88] : memref<9x1x64xf32, #tpu.memory_space<vmem>>, vector<1x1x64xf32>
    %184 = vector.shape_cast %183 : vector<1x1x64xf32> to vector<1x64xf32>
    %185 = vector.broadcast %184 : vector<1x64xf32> to vector<16x64xf32>
    %186 = arith.mulf %182, %185 : vector<16x64xf32>
    %187 = arith.addf %172, %186 : vector<16x64xf32>
    %c1_89 = arith.constant 1 : index
    %c0_90 = arith.constant 0 : index
    %c0_91 = arith.constant 0 : index
    %188 = vector.load %arg8[%c1_89, %c0_90, %c0_91] : memref<9x1x64xf32, #tpu.memory_space<vmem>>, vector<1x1x64xf32>
    %189 = vector.shape_cast %188 : vector<1x1x64xf32> to vector<1x64xf32>
    %190 = vector.broadcast %189 : vector<1x64xf32> to vector<16x64xf32>
    %191 = arith.mulf %177, %190 : vector<16x64xf32>
    %192 = arith.addf %187, %191 : vector<16x64xf32>
    %c63_i32_92 = arith.constant 63 : i32
    %193 = tpu.dynamic_rotate %177 by %c63_i32_92 dim 1 : vector<16x64xf32>, i32 -> vector<16x64xf32>
    %c6_i32 = arith.constant 6 : i32
    %194 = vector.broadcast %c6_i32 : i32 to vector<16x64xi32>
    %195 = arith.cmpi sle, %171, %194 : vector<16x64xi32>
    %cst_93 = arith.constant 0.000000e+00 : f32
    %196 = vector.broadcast %cst_93 : f32 to vector<16x64xf32>
    %197 = arith.select %195, %193, %196 : vector<16x64xi1>, vector<16x64xf32>
    %c2_94 = arith.constant 2 : index
    %c0_95 = arith.constant 0 : index
    %c0_96 = arith.constant 0 : index
    %198 = vector.load %arg8[%c2_94, %c0_95, %c0_96] : memref<9x1x64xf32, #tpu.memory_space<vmem>>, vector<1x1x64xf32>
    %199 = vector.shape_cast %198 : vector<1x1x64xf32> to vector<1x64xf32>
    %200 = vector.broadcast %199 : vector<1x64xf32> to vector<16x64xf32>
    %201 = arith.mulf %197, %200 : vector<16x64xf32>
    %202 = arith.addf %192, %201 : vector<16x64xf32>
    %c1_i32_97 = arith.constant 1 : i32
    %203 = tpu.dynamic_rotate %137 by %c1_i32_97 dim 1 : vector<16x64xf32>, i32 -> vector<16x64xf32>
    %c1_i32_98 = arith.constant 1 : i32
    %204 = vector.broadcast %c1_i32_98 : i32 to vector<16x64xi32>
    %205 = arith.cmpi sge, %171, %204 : vector<16x64xi32>
    %cst_99 = arith.constant 0.000000e+00 : f32
    %206 = vector.broadcast %cst_99 : f32 to vector<16x64xf32>
    %207 = arith.select %205, %203, %206 : vector<16x64xi1>, vector<16x64xf32>
    %c3_100 = arith.constant 3 : index
    %c0_101 = arith.constant 0 : index
    %c0_102 = arith.constant 0 : index
    %208 = vector.load %arg8[%c3_100, %c0_101, %c0_102] : memref<9x1x64xf32, #tpu.memory_space<vmem>>, vector<1x1x64xf32>
    %209 = vector.shape_cast %208 : vector<1x1x64xf32> to vector<1x64xf32>
    %210 = vector.broadcast %209 : vector<1x64xf32> to vector<16x64xf32>
    %211 = arith.mulf %207, %210 : vector<16x64xf32>
    %212 = arith.addf %202, %211 : vector<16x64xf32>
    %c4_103 = arith.constant 4 : index
    %c0_104 = arith.constant 0 : index
    %c0_105 = arith.constant 0 : index
    %213 = vector.load %arg8[%c4_103, %c0_104, %c0_105] : memref<9x1x64xf32, #tpu.memory_space<vmem>>, vector<1x1x64xf32>
    %214 = vector.shape_cast %213 : vector<1x1x64xf32> to vector<1x64xf32>
    %215 = vector.broadcast %214 : vector<1x64xf32> to vector<16x64xf32>
    %216 = arith.mulf %137, %215 : vector<16x64xf32>
    %217 = arith.addf %212, %216 : vector<16x64xf32>
    %c63_i32_106 = arith.constant 63 : i32
    %218 = tpu.dynamic_rotate %137 by %c63_i32_106 dim 1 : vector<16x64xf32>, i32 -> vector<16x64xf32>
    %c6_i32_107 = arith.constant 6 : i32
    %219 = vector.broadcast %c6_i32_107 : i32 to vector<16x64xi32>
    %220 = arith.cmpi sle, %171, %219 : vector<16x64xi32>
    %cst_108 = arith.constant 0.000000e+00 : f32
    %221 = vector.broadcast %cst_108 : f32 to vector<16x64xf32>
    %222 = arith.select %220, %218, %221 : vector<16x64xi1>, vector<16x64xf32>
    %c5_109 = arith.constant 5 : index
    %c0_110 = arith.constant 0 : index
    %c0_111 = arith.constant 0 : index
    %223 = vector.load %arg8[%c5_109, %c0_110, %c0_111] : memref<9x1x64xf32, #tpu.memory_space<vmem>>, vector<1x1x64xf32>
    %224 = vector.shape_cast %223 : vector<1x1x64xf32> to vector<1x64xf32>
    %225 = vector.broadcast %224 : vector<1x64xf32> to vector<16x64xf32>
    %226 = arith.mulf %222, %225 : vector<16x64xf32>
    %227 = arith.addf %217, %226 : vector<16x64xf32>
    %c15_i32 = arith.constant 15 : i32
    %228 = tpu.dynamic_rotate %137 by %c15_i32 dim 0 : vector<16x64xf32>, i32 -> vector<16x64xf32>
    %c6_i32_112 = arith.constant 6 : i32
    %229 = vector.broadcast %c6_i32_112 : i32 to vector<16x64xi32>
    %230 = arith.cmpi sle, %154, %229 : vector<16x64xi32>
    %cst_113 = arith.constant 0.000000e+00 : f32
    %231 = vector.broadcast %cst_113 : f32 to vector<16x64xf32>
    %232 = arith.select %230, %228, %231 : vector<16x64xi1>, vector<16x64xf32>
    %c1_i32_114 = arith.constant 1 : i32
    %233 = tpu.dynamic_rotate %232 by %c1_i32_114 dim 1 : vector<16x64xf32>, i32 -> vector<16x64xf32>
    %c1_i32_115 = arith.constant 1 : i32
    %234 = vector.broadcast %c1_i32_115 : i32 to vector<16x64xi32>
    %235 = arith.cmpi sge, %171, %234 : vector<16x64xi32>
    %cst_116 = arith.constant 0.000000e+00 : f32
    %236 = vector.broadcast %cst_116 : f32 to vector<16x64xf32>
    %237 = arith.select %235, %233, %236 : vector<16x64xi1>, vector<16x64xf32>
    %c6_117 = arith.constant 6 : index
    %c0_118 = arith.constant 0 : index
    %c0_119 = arith.constant 0 : index
    %238 = vector.load %arg8[%c6_117, %c0_118, %c0_119] : memref<9x1x64xf32, #tpu.memory_space<vmem>>, vector<1x1x64xf32>
    %239 = vector.shape_cast %238 : vector<1x1x64xf32> to vector<1x64xf32>
    %240 = vector.broadcast %239 : vector<1x64xf32> to vector<16x64xf32>
    %241 = arith.mulf %237, %240 : vector<16x64xf32>
    %242 = arith.addf %227, %241 : vector<16x64xf32>
    %c7_120 = arith.constant 7 : index
    %c0_121 = arith.constant 0 : index
    %c0_122 = arith.constant 0 : index
    %243 = vector.load %arg8[%c7_120, %c0_121, %c0_122] : memref<9x1x64xf32, #tpu.memory_space<vmem>>, vector<1x1x64xf32>
    %244 = vector.shape_cast %243 : vector<1x1x64xf32> to vector<1x64xf32>
    %245 = vector.broadcast %244 : vector<1x64xf32> to vector<16x64xf32>
    %246 = arith.mulf %232, %245 : vector<16x64xf32>
    %247 = arith.addf %242, %246 : vector<16x64xf32>
    %c63_i32_123 = arith.constant 63 : i32
    %248 = tpu.dynamic_rotate %232 by %c63_i32_123 dim 1 : vector<16x64xf32>, i32 -> vector<16x64xf32>
    %c6_i32_124 = arith.constant 6 : i32
    %249 = vector.broadcast %c6_i32_124 : i32 to vector<16x64xi32>
    %250 = arith.cmpi sle, %171, %249 : vector<16x64xi32>
    %cst_125 = arith.constant 0.000000e+00 : f32
    %251 = vector.broadcast %cst_125 : f32 to vector<16x64xf32>
    %252 = arith.select %250, %248, %251 : vector<16x64xi1>, vector<16x64xf32>
    %c8_126 = arith.constant 8 : index
    %c0_127 = arith.constant 0 : index
    %c0_128 = arith.constant 0 : index
    %253 = vector.load %arg8[%c8_126, %c0_127, %c0_128] : memref<9x1x64xf32, #tpu.memory_space<vmem>>, vector<1x1x64xf32>
    %254 = vector.shape_cast %253 : vector<1x1x64xf32> to vector<1x64xf32>
    %255 = vector.broadcast %254 : vector<1x64xf32> to vector<16x64xf32>
    %256 = arith.mulf %252, %255 : vector<16x64xf32>
    %257 = arith.addf %247, %256 : vector<16x64xf32>
    %c0_129 = arith.constant 0 : index
    %c0_130 = arith.constant 0 : index
    %258 = vector.load %arg9[%c0_129, %c0_130] : memref<1x64xf32, #tpu.memory_space<vmem>>, vector<1x64xf32>
    %259 = vector.broadcast %258 : vector<1x64xf32> to vector<16x64xf32>
    %260 = arith.addf %257, %259 : vector<16x64xf32>
    %c0_131 = arith.constant 0 : index
    %c0_132 = arith.constant 0 : index
    %261 = vector.load %arg10[%c0_131, %c0_132] : memref<64x32xf32, #tpu.memory_space<vmem>>, vector<64x32xf32>
    %cst_133 = arith.constant dense<0.000000e+00> : vector<16x32xf32>
    %262 = tpu.matmul %260, %261, %cst_133 {dimension_numbers = #tpu.dot_dimension_numbers<[1], [0], [0], [1], [0, 0, 1, 1], [], []>} : vector<16x64xf32>, vector<64x32xf32>, vector<16x32xf32> -> vector<16x32xf32>
    %c0_134 = arith.constant 0 : index
    %c0_135 = arith.constant 0 : index
    %263 = vector.load %arg11[%c0_134, %c0_135] : memref<1x32xf32, #tpu.memory_space<vmem>>, vector<1x32xf32>
    %264 = vector.broadcast %263 : vector<1x32xf32> to vector<16x32xf32>
    %265 = arith.addf %262, %264 : vector<16x32xf32>
    %cst_136 = arith.constant 0.000000e+00 : f32
    %266 = vector.broadcast %cst_136 : f32 to vector<16x32xf32>
    %267 = arith.maximumf %265, %266 : vector<16x32xf32>
    %c0_137 = arith.constant 0 : index
    %c0_138 = arith.constant 0 : index
    %268 = vector.load %arg20[%c0_137, %c0_138] : memref<16x32xf32, #tpu.memory_space<vmem>>, vector<16x32xf32>
    tpu.vector_store %arg20[%c0_137, %c0_138], %267 {strides = array<i32>} : memref<16x32xf32, #tpu.memory_space<vmem>>, vector<16x32xf32>,
    %c0_139 = arith.constant 0 : index
    %c0_140 = arith.constant 0 : index
    %269 = vector.load %arg12[%c0_139, %c0_140] : memref<32x64xf32, #tpu.memory_space<vmem>>, vector<32x64xf32>
    %c0_141 = arith.constant 0 : index
    %c0_142 = arith.constant 0 : index
    %270 = vector.load %arg13[%c0_141, %c0_142] : memref<32x64xf32, #tpu.memory_space<vmem>>, vector<32x64xf32>
    %cst_143 = arith.constant dense<0.000000e+00> : vector<16x64xf32>
    %271 = tpu.matmul %267, %270, %cst_143 {dimension_numbers = #tpu.dot_dimension_numbers<[1], [0], [0], [1], [0, 0, 1, 1], [], []>} : vector<16x32xf32>, vector<32x64xf32>, vector<16x64xf32> -> vector<16x64xf32>
    %c0_144 = arith.constant 0 : index
    %c0_145 = arith.constant 0 : index
    %272 = vector.load %arg14[%c0_144, %c0_145] : memref<32x16xf32, #tpu.memory_space<vmem>>, vector<32x16xf32>
    %cst_146 = arith.constant dense<0.000000e+00> : vector<32x64xf32>
    %273 = tpu.matmul %272, %271, %cst_146 {dimension_numbers = #tpu.dot_dimension_numbers<[1], [0], [0], [1], [0, 0, 1, 1], [], []>} : vector<32x16xf32>, vector<16x64xf32>, vector<32x64xf32> -> vector<32x64xf32>
    %274 = arith.addf %269, %273 : vector<32x64xf32>
    %275 = tpu.iota {dimensions = array<i32: 0>} : vector<32x64xi32>
    %c16_i32 = arith.constant 16 : i32
    %c0_i32_147 = arith.constant 0 : i32
    %276 = arith.cmpi eq, %c16_i32, %c0_i32_147 : i32
    %c1_i32_148 = arith.constant 1 : i32
    %277 = arith.select %276, %c1_i32_148, %c16_i32 : i32
    %278 = vector.broadcast %277 : i32 to vector<32x64xi32>
    %279 = arith.remsi %275, %278 : vector<32x64xi32>
    %c0_i32_149 = arith.constant 0 : i32
    %280 = vector.broadcast %c0_i32_149 : i32 to vector<32x64xi32>
    %281 = arith.cmpi ne, %279, %280 : vector<32x64xi32>
    %c0_i32_150 = arith.constant 0 : i32
    %282 = vector.broadcast %c0_i32_150 : i32 to vector<32x64xi32>
    %283 = arith.cmpi slt, %279, %282 : vector<32x64xi32>
    %c0_i32_151 = arith.constant 0 : i32
    %284 = arith.cmpi slt, %277, %c0_i32_151 : i32
    %285 = vector.broadcast %284 : i1 to vector<32x64xi1>
    %286 = vector.broadcast %285 : vector<32x64xi1> to vector<32x64xi1>
    %287 = arith.xori %283, %286 : vector<32x64xi1>
    %288 = arith.andi %287, %281 : vector<32x64xi1>
    %289 = vector.broadcast %277 : i32 to vector<32x64xi32>
    %290 = arith.addi %279, %289 : vector<32x64xi32>
    %291 = arith.select %288, %290, %279 : vector<32x64xi1>, vector<32x64xi32>
    %292 = tpu.iota {dimensions = array<i32: 1>} : vector<32x64xi32>
    %c16_i32_152 = arith.constant 16 : i32
    %c0_i32_153 = arith.constant 0 : i32
    %293 = arith.cmpi eq, %c16_i32_152, %c0_i32_153 : i32
    %c1_i32_154 = arith.constant 1 : i32
    %294 = arith.select %293, %c1_i32_154, %c16_i32_152 : i32
    %295 = vector.broadcast %294 : i32 to vector<32x64xi32>
    %296 = arith.remsi %292, %295 : vector<32x64xi32>
    %c0_i32_155 = arith.constant 0 : i32
    %297 = vector.broadcast %c0_i32_155 : i32 to vector<32x64xi32>
    %298 = arith.cmpi ne, %296, %297 : vector<32x64xi32>
    %c0_i32_156 = arith.constant 0 : i32
    %299 = vector.broadcast %c0_i32_156 : i32 to vector<32x64xi32>
    %300 = arith.cmpi slt, %296, %299 : vector<32x64xi32>
    %c0_i32_157 = arith.constant 0 : i32
    %301 = arith.cmpi slt, %294, %c0_i32_157 : i32
    %302 = vector.broadcast %301 : i1 to vector<32x64xi1>
    %303 = vector.broadcast %302 : vector<32x64xi1> to vector<32x64xi1>
    %304 = arith.xori %300, %303 : vector<32x64xi1>
    %305 = arith.andi %304, %298 : vector<32x64xi1>
    %306 = vector.broadcast %294 : i32 to vector<32x64xi32>
    %307 = arith.addi %296, %306 : vector<32x64xi32>
    %308 = arith.select %305, %307, %296 : vector<32x64xi1>, vector<32x64xi32>
    %cst_158 = arith.constant 0.000000e+00 : f32
    %309 = vector.broadcast %cst_158 : f32 to vector<32x64xf32>
    %c1_i32_159 = arith.constant 1 : i32
    %310 = tpu.dynamic_rotate %274 by %c1_i32_159 dim 0 : vector<32x64xf32>, i32 -> vector<32x64xf32>
    %c1_i32_160 = arith.constant 1 : i32
    %311 = vector.broadcast %c1_i32_160 : i32 to vector<32x64xi32>
    %312 = arith.cmpi sge, %291, %311 : vector<32x64xi32>
    %cst_161 = arith.constant 0.000000e+00 : f32
    %313 = vector.broadcast %cst_161 : f32 to vector<32x64xf32>
    %314 = arith.select %312, %310, %313 : vector<32x64xi1>, vector<32x64xf32>
    %c1_i32_162 = arith.constant 1 : i32
    %315 = tpu.dynamic_rotate %314 by %c1_i32_162 dim 1 : vector<32x64xf32>, i32 -> vector<32x64xf32>
    %c1_i32_163 = arith.constant 1 : i32
    %316 = vector.broadcast %c1_i32_163 : i32 to vector<32x64xi32>
    %317 = arith.cmpi sge, %308, %316 : vector<32x64xi32>
    %cst_164 = arith.constant 0.000000e+00 : f32
    %318 = vector.broadcast %cst_164 : f32 to vector<32x64xf32>
    %319 = arith.select %317, %315, %318 : vector<32x64xi1>, vector<32x64xf32>
    %c0_165 = arith.constant 0 : index
    %c0_166 = arith.constant 0 : index
    %c0_167 = arith.constant 0 : index
    %320 = vector.load %arg15[%c0_165, %c0_166, %c0_167] : memref<9x1x64xf32, #tpu.memory_space<vmem>>, vector<1x1x64xf32>
    %321 = vector.shape_cast %320 : vector<1x1x64xf32> to vector<1x64xf32>
    %322 = vector.broadcast %321 : vector<1x64xf32> to vector<32x64xf32>
    %323 = arith.mulf %319, %322 : vector<32x64xf32>
    %324 = arith.addf %309, %323 : vector<32x64xf32>
    %c1_168 = arith.constant 1 : index
    %c0_169 = arith.constant 0 : index
    %c0_170 = arith.constant 0 : index
    %325 = vector.load %arg15[%c1_168, %c0_169, %c0_170] : memref<9x1x64xf32, #tpu.memory_space<vmem>>, vector<1x1x64xf32>
    %326 = vector.shape_cast %325 : vector<1x1x64xf32> to vector<1x64xf32>
    %327 = vector.broadcast %326 : vector<1x64xf32> to vector<32x64xf32>
    %328 = arith.mulf %314, %327 : vector<32x64xf32>
    %329 = arith.addf %324, %328 : vector<32x64xf32>
    %c63_i32_171 = arith.constant 63 : i32
    %330 = tpu.dynamic_rotate %314 by %c63_i32_171 dim 1 : vector<32x64xf32>, i32 -> vector<32x64xf32>
    %c14_i32 = arith.constant 14 : i32
    %331 = vector.broadcast %c14_i32 : i32 to vector<32x64xi32>
    %332 = arith.cmpi sle, %308, %331 : vector<32x64xi32>
    %cst_172 = arith.constant 0.000000e+00 : f32
    %333 = vector.broadcast %cst_172 : f32 to vector<32x64xf32>
    %334 = arith.select %332, %330, %333 : vector<32x64xi1>, vector<32x64xf32>
    %c2_173 = arith.constant 2 : index
    %c0_174 = arith.constant 0 : index
    %c0_175 = arith.constant 0 : index
    %335 = vector.load %arg15[%c2_173, %c0_174, %c0_175] : memref<9x1x64xf32, #tpu.memory_space<vmem>>, vector<1x1x64xf32>
    %336 = vector.shape_cast %335 : vector<1x1x64xf32> to vector<1x64xf32>
    %337 = vector.broadcast %336 : vector<1x64xf32> to vector<32x64xf32>
    %338 = arith.mulf %334, %337 : vector<32x64xf32>
    %339 = arith.addf %329, %338 : vector<32x64xf32>
    %c1_i32_176 = arith.constant 1 : i32
    %340 = tpu.dynamic_rotate %274 by %c1_i32_176 dim 1 : vector<32x64xf32>, i32 -> vector<32x64xf32>
    %c1_i32_177 = arith.constant 1 : i32
    %341 = vector.broadcast %c1_i32_177 : i32 to vector<32x64xi32>
    %342 = arith.cmpi sge, %308, %341 : vector<32x64xi32>
    %cst_178 = arith.constant 0.000000e+00 : f32
    %343 = vector.broadcast %cst_178 : f32 to vector<32x64xf32>
    %344 = arith.select %342, %340, %343 : vector<32x64xi1>, vector<32x64xf32>
    %c3_179 = arith.constant 3 : index
    %c0_180 = arith.constant 0 : index
    %c0_181 = arith.constant 0 : index
    %345 = vector.load %arg15[%c3_179, %c0_180, %c0_181] : memref<9x1x64xf32, #tpu.memory_space<vmem>>, vector<1x1x64xf32>
    %346 = vector.shape_cast %345 : vector<1x1x64xf32> to vector<1x64xf32>
    %347 = vector.broadcast %346 : vector<1x64xf32> to vector<32x64xf32>
    %348 = arith.mulf %344, %347 : vector<32x64xf32>
    %349 = arith.addf %339, %348 : vector<32x64xf32>
    %c4_182 = arith.constant 4 : index
    %c0_183 = arith.constant 0 : index
    %c0_184 = arith.constant 0 : index
    %350 = vector.load %arg15[%c4_182, %c0_183, %c0_184] : memref<9x1x64xf32, #tpu.memory_space<vmem>>, vector<1x1x64xf32>
    %351 = vector.shape_cast %350 : vector<1x1x64xf32> to vector<1x64xf32>
    %352 = vector.broadcast %351 : vector<1x64xf32> to vector<32x64xf32>
    %353 = arith.mulf %274, %352 : vector<32x64xf32>
    %354 = arith.addf %349, %353 : vector<32x64xf32>
    %c63_i32_185 = arith.constant 63 : i32
    %355 = tpu.dynamic_rotate %274 by %c63_i32_185 dim 1 : vector<32x64xf32>, i32 -> vector<32x64xf32>
    %c14_i32_186 = arith.constant 14 : i32
    %356 = vector.broadcast %c14_i32_186 : i32 to vector<32x64xi32>
    %357 = arith.cmpi sle, %308, %356 : vector<32x64xi32>
    %cst_187 = arith.constant 0.000000e+00 : f32
    %358 = vector.broadcast %cst_187 : f32 to vector<32x64xf32>
    %359 = arith.select %357, %355, %358 : vector<32x64xi1>, vector<32x64xf32>
    %c5_188 = arith.constant 5 : index
    %c0_189 = arith.constant 0 : index
    %c0_190 = arith.constant 0 : index
    %360 = vector.load %arg15[%c5_188, %c0_189, %c0_190] : memref<9x1x64xf32, #tpu.memory_space<vmem>>, vector<1x1x64xf32>
    %361 = vector.shape_cast %360 : vector<1x1x64xf32> to vector<1x64xf32>
    %362 = vector.broadcast %361 : vector<1x64xf32> to vector<32x64xf32>
    %363 = arith.mulf %359, %362 : vector<32x64xf32>
    %364 = arith.addf %354, %363 : vector<32x64xf32>
    %c31_i32 = arith.constant 31 : i32
    %365 = tpu.dynamic_rotate %274 by %c31_i32 dim 0 : vector<32x64xf32>, i32 -> vector<32x64xf32>
    %c14_i32_191 = arith.constant 14 : i32
    %366 = vector.broadcast %c14_i32_191 : i32 to vector<32x64xi32>
    %367 = arith.cmpi sle, %291, %366 : vector<32x64xi32>
    %cst_192 = arith.constant 0.000000e+00 : f32
    %368 = vector.broadcast %cst_192 : f32 to vector<32x64xf32>
    %369 = arith.select %367, %365, %368 : vector<32x64xi1>, vector<32x64xf32>
    %c1_i32_193 = arith.constant 1 : i32
    %370 = tpu.dynamic_rotate %369 by %c1_i32_193 dim 1 : vector<32x64xf32>, i32 -> vector<32x64xf32>
    %c1_i32_194 = arith.constant 1 : i32
    %371 = vector.broadcast %c1_i32_194 : i32 to vector<32x64xi32>
    %372 = arith.cmpi sge, %308, %371 : vector<32x64xi32>
    %cst_195 = arith.constant 0.000000e+00 : f32
    %373 = vector.broadcast %cst_195 : f32 to vector<32x64xf32>
    %374 = arith.select %372, %370, %373 : vector<32x64xi1>, vector<32x64xf32>
    %c6_196 = arith.constant 6 : index
    %c0_197 = arith.constant 0 : index
    %c0_198 = arith.constant 0 : index
    %375 = vector.load %arg15[%c6_196, %c0_197, %c0_198] : memref<9x1x64xf32, #tpu.memory_space<vmem>>, vector<1x1x64xf32>
    %376 = vector.shape_cast %375 : vector<1x1x64xf32> to vector<1x64xf32>
    %377 = vector.broadcast %376 : vector<1x64xf32> to vector<32x64xf32>
    %378 = arith.mulf %374, %377 : vector<32x64xf32>
    %379 = arith.addf %364, %378 : vector<32x64xf32>
    %c7_199 = arith.constant 7 : index
    %c0_200 = arith.constant 0 : index
    %c0_201 = arith.constant 0 : index
    %380 = vector.load %arg15[%c7_199, %c0_200, %c0_201] : memref<9x1x64xf32, #tpu.memory_space<vmem>>, vector<1x1x64xf32>
    %381 = vector.shape_cast %380 : vector<1x1x64xf32> to vector<1x64xf32>
    %382 = vector.broadcast %381 : vector<1x64xf32> to vector<32x64xf32>
    %383 = arith.mulf %369, %382 : vector<32x64xf32>
    %384 = arith.addf %379, %383 : vector<32x64xf32>
    %c63_i32_202 = arith.constant 63 : i32
    %385 = tpu.dynamic_rotate %369 by %c63_i32_202 dim 1 : vector<32x64xf32>, i32 -> vector<32x64xf32>
    %c14_i32_203 = arith.constant 14 : i32
    %386 = vector.broadcast %c14_i32_203 : i32 to vector<32x64xi32>
    %387 = arith.cmpi sle, %308, %386 : vector<32x64xi32>
    %cst_204 = arith.constant 0.000000e+00 : f32
    %388 = vector.broadcast %cst_204 : f32 to vector<32x64xf32>
    %389 = arith.select %387, %385, %388 : vector<32x64xi1>, vector<32x64xf32>
    %c8_205 = arith.constant 8 : index
    %c0_206 = arith.constant 0 : index
    %c0_207 = arith.constant 0 : index
    %390 = vector.load %arg15[%c8_205, %c0_206, %c0_207] : memref<9x1x64xf32, #tpu.memory_space<vmem>>, vector<1x1x64xf32>
    %391 = vector.shape_cast %390 : vector<1x1x64xf32> to vector<1x64xf32>
    %392 = vector.broadcast %391 : vector<1x64xf32> to vector<32x64xf32>
    %393 = arith.mulf %389, %392 : vector<32x64xf32>
    %394 = arith.addf %384, %393 : vector<32x64xf32>
    %c0_208 = arith.constant 0 : index
    %c0_209 = arith.constant 0 : index
    %395 = vector.load %arg16[%c0_208, %c0_209] : memref<1x64xf32, #tpu.memory_space<vmem>>, vector<1x64xf32>
    %396 = vector.broadcast %395 : vector<1x64xf32> to vector<32x64xf32>
    %397 = arith.addf %394, %396 : vector<32x64xf32>
    %c0_210 = arith.constant 0 : index
    %c0_211 = arith.constant 0 : index
    %398 = vector.load %arg17[%c0_210, %c0_211] : memref<64x64xf32, #tpu.memory_space<vmem>>, vector<64x64xf32>
    %cst_212 = arith.constant dense<0.000000e+00> : vector<32x64xf32>
    %399 = tpu.matmul %397, %398, %cst_212 {dimension_numbers = #tpu.dot_dimension_numbers<[1], [0], [0], [1], [0, 0, 1, 1], [], []>} : vector<32x64xf32>, vector<64x64xf32>, vector<32x64xf32> -> vector<32x64xf32>
    %c0_213 = arith.constant 0 : index
    %c0_214 = arith.constant 0 : index
    %400 = vector.load %arg18[%c0_213, %c0_214] : memref<1x64xf32, #tpu.memory_space<vmem>>, vector<1x64xf32>
    %401 = vector.broadcast %400 : vector<1x64xf32> to vector<32x64xf32>
    %402 = arith.addf %399, %401 : vector<32x64xf32>
    %cst_215 = arith.constant 0.000000e+00 : f32
    %403 = vector.broadcast %cst_215 : f32 to vector<32x64xf32>
    %404 = arith.maximumf %402, %403 : vector<32x64xf32>
    %c0_216 = arith.constant 0 : index
    %c0_217 = arith.constant 0 : index
    %405 = vector.load %arg21[%c0_216, %c0_217] : memref<32x64xf32, #tpu.memory_space<vmem>>, vector<32x64xf32>
    tpu.vector_store %arg21[%c0_216, %c0_217], %404 {strides = array<i32>} : memref<32x64xf32, #tpu.memory_space<vmem>>, vector<32x64xf32>,
    return
  }
}

</mosaic_0001>

<bundles_post_ra>
// kernel: tpu_custom_call.1
= control target key start
LH: loop header
LB: loop body
LE: loop exit
PB: predicated region body
PF: predicated region fallthrough
CT: control target
= control target key end

     0   :  { %s2941_s0 = inlined_call_operand.hbm [shape: f32[8,64], index: 0, kind: input, shape index: {}]   ;;  %s2942_s1 = inlined_call_operand.vmem [shape: f32[9,1,64], index: 1, kind: input, shape index: {}]   ;;  %s2943_s2 = inlined_call_operand.hbm [shape: f32[1,64], index: 2, kind: input, shape index: {}]   ;;  %s2944_s3 = inlined_call_operand.vmem [shape: f32[64,32], index: 3, kind: input, shape index: {}]   ;;  %s2945_s4 = inlined_call_operand.hbm [shape: f32[1,32], index: 4, kind: input, shape index: {}]   ;;  %s2946_s5 = inlined_call_operand.vmem [shape: f32[16,64], index: 5, kind: input, shape index: {}]   ;;  %s2947_s6 = inlined_call_operand.vmem [shape: f32[32,64], index: 6, kind: input, shape index: {}]   ;;  %s2948_s7 = inlined_call_operand.vmem [shape: f32[16,8], index: 7, kind: input, shape index: {}]   ;;  %s2949_s8 = inlined_call_operand.vmem [shape: f32[9,1,64], index: 8, kind: input, shape index: {}]   ;;  %s2950_s9 = inlined_call_operand.vmem [shape: f32[1,64], index: 9, kind: input, shape index: {}]   ;;  %s2951_s10 = inlined_call_operand.vmem [shape: f32[64,32], index: 10, kind: input, shape index: {}]   ;;  %s2952_s11 = inlined_call_operand.vmem [shape: f32[1,32], index: 11, kind: input, shape index: {}]   ;;  %s2953_s12 = inlined_call_operand.vmem [shape: f32[32,64], index: 12, kind: input, shape index: {}]   ;;  %s2954_s13 = inlined_call_operand.vmem [shape: f32[32,64], index: 13, kind: input, shape index: {}]   ;;  %s2955_s14 = inlined_call_operand.vmem [shape: f32[32,16], index: 14, kind: input, shape index: {}]   ;;  %s2956_s15 = inlined_call_operand.vmem [shape: f32[9,1,64], index: 15, kind: input, shape index: {}]   ;;  %s2957_s16 = inlined_call_operand.vmem [shape: f32[1,64], index: 16, kind: input, shape index: {}]   ;;  %s2958_s17 = inlined_call_operand.vmem [shape: f32[64,64], index: 17, kind: input, shape index: {}]   ;;  %s2959_s18 = inlined_call_operand.vmem [shape: f32[1,64], index: 18, kind: input, shape index: {}]   ;;  %s2960_s19 = inlined_call_operand.hbm [shape: f32[8,32], index: 19, kind: output, shape index: {0}]   ;;  %s2961_s20 = inlined_call_operand.hbm [shape: f32[16,32], index: 20, kind: output, shape index: {1}]   ;;  %s2962_s21 = inlined_call_operand.hbm [shape: f32[32,64], index: 21, kind: output, shape index: {2}]  }
   0x1   :  { %2966 = sst [smem:[#allocation16_spill]] %s2941_s0 }
   0x2   :  { %2967 = sst [smem:[#allocation17_spill]] %s2942_s1 }
   0x3   :  { %2968 = sst [smem:[#allocation18_spill]] %s2943_s2 }
   0x4   :  { %2969 = sst [smem:[#allocation19_spill]] %s2944_s3 }
   0x5   :  { %2970 = sst [smem:[#allocation20_spill]] %s2945_s4 }
   0x6   :  { %2971 = sst [smem:[#allocation21_spill]] %s2946_s5 }
   0x7   :  { %27 = vsyncpa [#allocation3], 0 }
   0x8   :  { %28 = vsyncpa [#allocation6], 0 }
   0x9   :  { %29 = vsyncpa [#allocation4], 0 }
   0xa   :  { %30 = vsyncpa [#allocation10], 0  ;;  %s2056_s2 = smov [#allocation5]   ;;  %s2057_s26 = smov [#allocation2]  }
   0xb   :  { %s49_s25 = sshll.u32 %s2056_s2, 4  ;;  %s37_s27 = sshll.u32 %s2057_s26, 4  ;;  %s50_s25 = int_to_ptr.vmem [resolvable:$true] %s49_s25  ;;  %s38_s27 = int_to_ptr.vmem [resolvable:$true] %s37_s27 }
   0xc   :  { %s1936_s3 = scalar_lea.vmem %s50_s25, 16  ;;  %s1940_s28 = scalar_lea.vmem %s50_s25, 32 }
   0xd   :  { %p1937_p0 = scmp.ne.s32.totalorder %s50_s25, %s1936_s3  ;;  %p1941_p1 = scmp.lt.s32.totalorder %s50_s25, %s50_s25 }
   0xe   :  { %p1942_p2 = scmp.lt.s32.totalorder %s1940_s28, %s1936_s3 }
  0x10   :  { %p1943_p3 = por %p1942_p2, %p1941_p1 }
  0x12   :  { %p1944_p4 = pnand %p1943_p3, %p1937_p0 }
  0x14   :  { %1947 = shalt.err (!%p1944_p4)
}
  0x15   :  { %s2972_s4 = sld [smem:[#allocation18_spill]]  ;;  %s1956_s30 = scalar_lea.vmem %s38_s27, 128 }
  0x16   :  { %p1957_p5 = scmp.ne.s32.totalorder %s38_s27, %s1956_s30  ;;  %p1961_p6 = scmp.lt.s32.totalorder %s38_s27, %s38_s27 }
  0x17   :  { %p1962_p7 = scmp.lt.s32.totalorder %s1956_s30, %s1956_s30 }
  0x19   :  { %p1963_p8 = por %p1962_p7, %p1961_p6 }
  0x1b   :  { %52 = dma.hbm_to_vmem [thread:$0]  %s2972_s4, 16, %s50_s25, [#allocation6]  }
  0x1c   :  { %p1964_p9 = pnand %p1963_p8, %p1957_p5 }
  0x1e   :  { %1967 = shalt.err (!%p1964_p9)
}
  0x1f   :  { %s2973_s23 = sld [smem:[#allocation16_spill]]  ;;  %s2058_s1 = smov [#allocation7]  }
  0x20   :  { %s61_s24 = sshll.u32 %s2058_s1, 4  ;;  %s62_s24 = int_to_ptr.vmem [resolvable:$true] %s61_s24 }
  0x21   :  { %s1976_s2 = scalar_lea.vmem %s62_s24, 16  ;;  %s1980_s26 = scalar_lea.vmem %s62_s24, 32 }
  0x22   :  { %p1977_p10 = scmp.ne.s32.totalorder %s62_s24, %s1976_s2  ;;  %p1981_p11 = scmp.lt.s32.totalorder %s62_s24, %s62_s24 }
  0x23   :  { %p1982_p12 = scmp.lt.s32.totalorder %s1980_s26, %s1976_s2 }
  0x25   :  { %40 = dma.hbm_to_vmem [thread:$0]  %s2973_s23, 128, %s38_s27, [#allocation3]  }
  0x26   :  { %p1983_p13 = por %p1982_p12, %p1981_p11 }
  0x28   :  { %p1984_p0 = pnand %p1983_p13, %p1977_p10 }
  0x2a   :  { %1987 = shalt.err (!%p1984_p0)
}
  0x2b   :  { %s2974_s28 = sld [smem:[#allocation20_spill]] }
  0x31   :  { %64 = dma.hbm_to_vmem [thread:$0]  %s2974_s28, 16, %s62_s24, [#allocation6]  }
  0x32   :  { %2048 = dma.done.wait [#allocation3], 128  }
  0x33   :  { %2049 = vsyncadd [#allocation3], 4294967168 }
  0x34   :  { %2050 = dma.done.wait [#allocation6], 32  }
  0x35   :  { %2051 = vsyncadd [#allocation6], 4294967264  ;;  %v103_v0 = vlaneseq  ;;  %v2192_v3 = vld [vmem:[#allocation2] sm:$0xff]  ;;  %s2059_s27 = smov 64   ;;  %vm134_vm2 = vcmask 1048064   ;;  %v2060_v14 = vmov 0.0  }
  0x36   :  { %v131_v4 = vrot.slane %v2192_v3, 7  ;;  %v226_v5 = vrot.slane %v2192_v3, 1  ;;  %1818 = vmatprep.subr.mxu0 %v2060_v14  ;;  %s2975_s4 = sld [smem:[#allocation19_spill]]  ;;  %1837 = vmatprep.subr.mxu1 %v2060_v14  ;;  %s2061_s2 = smov 127   ;;  %vm2063_vm3 = vmmov 0   ;;  %v379_v29 = vld [vmem:[%s2947_s6 + $0x18] sm:$0xff] }
  0x37   :  { %v2189_v1 = vshrl.u32 %v103_v0, 7  ;;  %s2062_s26 = smov 65   ;;  %1834 = vmatprep.mubr.msk.f32.mxu0 %vm2063_vm3, %v2060_v14  ;;  %1845 = vmatprep.mubr.msk.f32.mxu1 %vm2063_vm3, %v2060_v14  ;;  %v2267_v30 = vand.u32 127, %v103_v0  ;;  %s2976_s3 = sld [smem:[#allocation17_spill]]  ;;  %vm297_vm6 = vcmask 523264   ;;  %vm372_vm7 = vcmask 261120  }
  0x38   :  { %1838 = vmatpush3.msra.mxu1 %v379_v29  ;;  %vm455_vm8 = vcmask 64512   ;;  %s2981_s30 = sld [smem:[#allocation21_spill]] }
  0x39   :  { %v109_v2 = vand.u32 3, %v2189_v1  ;;  %1839 = vmatprep.subr.mxu1 %v2060_v14  ;;  %v123_v31 = vand.u32 3, %v2267_v30  ;;  %vm578_vm9 = vcmp.lt.s32.totalorder %v2189_v1, 1  ;;  %vm720_vm12 = vcmp.lt.s32.totalorder %v2189_v1, 7 }
  0x3b   :  { %vm132_vm0 = vcmp.ge.s32.totalorder %v109_v2, 1  ;;  %vm227_vm1 = vcmp.le.s32.totalorder %v109_v2, 2  ;;  %vm2273_vm4 = vcmp.le.s32.totalorder %v123_v31, 2  ;;  %vm2277_vm5 = vcmp.ge.s32.totalorder %v123_v31, 1 }
  0x3c   :  { %v2196_v6 = vsel %vm132_vm0, %v131_v4, 0.0  ;;  %v2198_v7 = vsel %vm227_vm1, %v226_v5, 0.0  ;;  %v289_v15 = vld [vmem:[%s2975_s4 + $0x38] sm:$0xff]  ;;  %v288_v16 = vld [vmem:[%s2975_s4 + $0x30] sm:$0xff]  ;;  %v287_v17 = vld [vmem:[%s2975_s4 + $0x28] sm:$0xff]  ;;  %vm995_vm1 = vcmask 130048  }
  0x3d   :  { %135 = vrot.lane.b32.xlu0 %v2196_v6, %s2059_s27  ;;  %229 = vrot.lane.b32.xlu1 %v2198_v7, %s2059_s27  ;;  %v286_v19 = vld [vmem:[%s2975_s4 + $0x20] sm:$0xff]  ;;  %v285_v21 = vld [vmem:[%s2975_s4 + $0x18] sm:$0xff] }
  0x3e   :  { %1819 = vmatpush3.msra.mxu0 %v289_v15  ;;  %v284_v25 = vld [vmem:[%s2975_s4 + $0x10] sm:$0xff]  ;;  %v283_v27 = vld [vmem:[%s2975_s4 + $0x8] sm:$0xff]  ;;  %v282_v28 = vld [vmem:[%s2975_s4] sm:$0xff] }
  0x3f   :  { %1820 = vmatprep.subr.mxu0 %v2060_v14  ;;  %v1696_v32 = vld [vmem:[%s2976_s3 + $0x1] ss:$0 sm:$0xff]  ;;  %v1694_v35 = vld [vmem:[%s2976_s3] ss:$0 sm:$0xff]  ;;  %v1698_v39 = vld [vmem:[%s2976_s3 + $0x2] ss:$0 sm:$0xff] }
  0x40   :  { %1821 = vmatpush3.msra.mxu0 %v288_v16  ;;  %v164_v38 = vmul.f32 %v1696_v32, %v2196_v6  ;;  %v1700_v43 = vld [vmem:[%s2976_s3 + $0x3] ss:$0 sm:$0xff]  ;;  %v1702_v44 = vld [vmem:[%s2976_s3 + $0x4] ss:$0 sm:$0xff]  ;;  %v1704_v53 = vld [vmem:[%s2976_s3 + $0x5] ss:$0 sm:$0xff] }
  0x41   :  { %181 = vrot.lane.b32.xlu0 %v2192_v3, %s2059_s27  ;;  %1822 = vmatprep.subr.mxu0 %v2060_v14  ;;  %v210_v50 = vmul.f32 %v1702_v44, %v2192_v3  ;;  %v1706_v55 = vld [vmem:[%s2976_s3 + $0x6] ss:$0 sm:$0xff]  ;;  %v1708_v58 = vld [vmem:[%s2976_s3 + $0x7] ss:$0 sm:$0xff]  ;;  %v1712_v15 = vld [vmem:[#allocation7] ss:$0 sm:$0xff] }
  0x42   :  { %1823 = vmatpush3.msra.mxu0 %v287_v17  ;;  %v258_v0 = vmul.f32 %v1708_v58, %v2198_v7 }
  0x43   :  { %1824 = vmatprep.subr.mxu0 %v2060_v14 }
  0x44   :  { %1825 = vmatpush3.msra.mxu0 %v286_v19 }
  0x45   :  { %1826 = vmatprep.subr.mxu0 %v2060_v14 }
  0x46   :  { %1827 = vmatpush3.msra.mxu0 %v285_v21  ;;  %v454_v21 = vld [vmem:[%s2948_s7 + $0x8] sm:$0xff] }
  0x47   :  { %1828 = vmatprep.subr.mxu0 %v2060_v14 }
  0x48   :  { %1829 = vmatpush3.msra.mxu0 %v284_v25 }
  0x49   :  { %1830 = vmatprep.subr.mxu0 %v2060_v14 }
  0x4a   :  { %1831 = vmatpush3.msra.mxu0 %v283_v27 }
  0x4b   :  { %1832 = vmatprep.subr.mxu0 %v2060_v14 }
  0x4c   :  { %1833 = vmatpush3.msra.mxu0 %v282_v28  ;;  %v544_v28 = vand.u32 7, %v2189_v1 }
  0x4e   :  { %vm581_vm10 = vcmp.ge.s32.totalorder %v544_v28, 1  ;;  %vm723_vm13 = vcmp.le.s32.totalorder %v544_v28, 6  ;;  %v908_v28 = vld [vmem:[%s2954_s13 + $0x10] sm:$0xff] }
  0xaf   :  { %v136_v8 = vpop.permute.xlu0 %135  ;;  %v230_v9 = vpop.permute.xlu1 %229 }
  0xb0   :  { %v137_v10 = vsel %vm134_vm2, %v136_v8, %v2196_v6  ;;  %v231_v11 = vsel %vm134_vm2, %v230_v9, %v2198_v7  ;;  %v1711_v9 = vld [vmem:[#allocation5] ss:$0 sm:$0xff] }
  0xb1   :  { %138 = vrot.lane.b32.xlu1 %v137_v10, %s2059_s27 }
  0xb3   :  { %v182_v12 = vpop.permute.xlu0 %181 }
  0xb4   :  { %v183_v13 = vsel %vm134_vm2, %v182_v12, %v2192_v3  ;;  %v377_v12 = vld [vmem:[%s2947_s6 + $0x8] sm:$0xff] }
  0xb5   :  { %184 = vrot.lane.b32.xlu0 %v183_v13, %s2059_s27  ;;  %232 = vrot.lane.b32.xlu1 %v231_v11, %s2059_s27  ;;  %v376_v13 = vld [vmem:[%s2947_s6] sm:$0xff] }
 0x123   :  { %v139_v18 = vpop.permute.xlu1 %138 }
 0x124   :  { %v140_v20 = vsel %vm134_vm2, %v139_v18, %v2196_v6 }
 0x125   :  { %167 = vrot.lane.b32.xlu1 %v140_v20, %s2061_s2  ;;  %143 = vrot.lane.b32.xlu0 %v140_v20, %s2062_s26  ;;  %v453_v20 = vld [vmem:[%s2948_s7] sm:$0xff] }
 0x127   :  { %v185_v22 = vpop.permute.xlu0 %184  ;;  %v233_v23 = vpop.permute.xlu1 %232 }
 0x128   :  { %v186_v24 = vsel %vm134_vm2, %v185_v22, %v2192_v3  ;;  %v234_v26 = vsel %vm134_vm2, %v233_v23, %v2198_v7  ;;  %v1710_v3 = vld [vmem:[%s2976_s3 + $0x8] ss:$0 sm:$0xff]  ;;  %v378_v7 = vld [vmem:[%s2947_s6 + $0x10] sm:$0xff]  ;;  %v2341_v23 = vadd.s32 8, %v2189_v1 }
 0x129   :  { %212 = vrot.lane.b32.xlu1 %v186_v24, %s2061_s2  ;;  %188 = vrot.lane.b32.xlu0 %v186_v24, %s2062_s26  ;;  %v375_v24 = vld [vmem:[%s2981_s30 + $0x8] sm:$0xff] }
 0x12a   :  { %1840 = vmatpush3.msra.mxu1 %v378_v7  ;;  %v551_v29 = vand.u32 7, %v2341_v23 }
 0x12b   :  { %1841 = vmatprep.subr.mxu1 %v2060_v14 }
 0x12c   :  { %1842 = vmatpush3.msra.mxu1 %v377_v12  ;;  %vm582_vm11 = vcmp.ge.s32.totalorder %v551_v29, 1  ;;  %vm724_vm14 = vcmp.le.s32.totalorder %v551_v29, 6  ;;  %v1721_v29 = vld [vmem:[%s2949_s8 + $0x2] ss:$0 sm:$0xff] }
 0x12d   :  { %260 = vrot.lane.b32.xlu1 %v234_v26, %s2061_s2  ;;  %236 = vrot.lane.b32.xlu0 %v234_v26, %s2062_s26  ;;  %v374_v26 = vld [vmem:[%s2981_s30] sm:$0xff] }
 0x12e   :  { %1843 = vmatprep.subr.mxu1 %v2060_v14 }
 0x12f   :  { %1844 = vmatpush3.msra.mxu1 %v376_v13  ;;  %v802_v13 = vld [vmem:[%s2951_s10] sm:$0xff] }
 0x197   :  { %v168_v36 = vpop.permute.xlu1 %167  ;;  %v144_v37 = vpop.permute.xlu0 %143 }
 0x198   :  { %v170_v40 = vsel %vm2273_vm4, %v168_v36, 0.0  ;;  %v146_v41 = vsel %vm2277_vm5, %v144_v37, 0.0 }
 0x199   :  { %v154_v42 = vmul.f32 %v1694_v35, %v146_v41  ;;  %v179_v45 = vmul.f32 %v1698_v39, %v170_v40 }
 0x19b   :  { %v165_v46 = vadd.f32 %v164_v38, %v154_v42  ;;  %v213_v47 = vpop.permute.xlu1 %212  ;;  %v189_v48 = vpop.permute.xlu0 %188 }
 0x19c   :  { %v191_v49 = vsel %vm2277_vm5, %v189_v48, 0.0  ;;  %v215_v54 = vsel %vm2273_vm4, %v213_v47, 0.0 }
 0x19d   :  { %v180_v51 = vadd.f32 %v179_v45, %v165_v46  ;;  %v200_v52 = vmul.f32 %v1700_v43, %v191_v49  ;;  %v224_v60 = vmul.f32 %v1704_v53, %v215_v54 }
 0x19f   :  { %v201_v56 = vadd.f32 %v200_v52, %v180_v51  ;;  %v237_v57 = vpop.permute.xlu0 %236  ;;  %v261_v62 = vpop.permute.xlu1 %260 }
 0x1a0   :  { %v239_v59 = vsel %vm2277_vm5, %v237_v57, 0.0  ;;  %v263_v4 = vsel %vm2273_vm4, %v261_v62, 0.0 }
 0x1a1   :  { %v211_v61 = vadd.f32 %v210_v50, %v201_v56  ;;  %v248_v63 = vmul.f32 %v1706_v55, %v239_v59  ;;  %v272_v6 = vmul.f32 %v1710_v3, %v263_v4 }
 0x1a3   :  { %v225_v2 = vadd.f32 %v224_v60, %v211_v61  ;;  %v809_v61 = vld [vmem:[%s2951_s10 + $0x38] sm:$0xff] }
 0x1a5   :  { %v249_v5 = vadd.f32 %v248_v63, %v225_v2  ;;  %v807_v2 = vld [vmem:[%s2951_s10 + $0x28] sm:$0xff] }
 0x1a7   :  { %v259_v8 = vadd.f32 %v258_v0, %v249_v5  ;;  %v808_v0 = vld [vmem:[%s2951_s10 + $0x30] sm:$0xff]  ;;  %v806_v5 = vld [vmem:[%s2951_s10 + $0x20] sm:$0xff] }
 0x1a9   :  { %v273_v10 = vadd.f32 %v272_v6, %v259_v8  ;;  %v805_v6 = vld [vmem:[%s2951_s10 + $0x18] sm:$0xff]  ;;  %v804_v8 = vld [vmem:[%s2951_s10 + $0x10] sm:$0xff] }
 0x1ab   :  { %v281_v11 = vadd.f32 %v1711_v9, %v273_v10 }
 0x1ad   :  { %1835 = vmatmul.mubr.msk.f32.vlgmr.msra.gmra.mxu0 %vm297_vm6, %v281_v11  ;;  %v803_v11 = vld [vmem:[%s2951_s10 + $0x8] sm:$0xff] }
 0x26d   :  { %v367_v16 = vpop.f32.mrf.mxu0 }
 0x26e   :  { %v368_v17 = vadd.f32 %v1712_v15, %v367_v16  ;;  %v568_v15 = vand.u32 7, %v2267_v30 }
 0x26f   :  { %v1836_v18 = vpop.f32.mrf.mxu0 }
 0x270   :  { %v371_v19 = vmax.f32 %v368_v17, 0.0  ;;  %v1717_v18 = vld [vmem:[%s2949_s8] ss:$0 sm:$0xff]  ;;  %vm2459_vm15 = vcmp.ge.s32.totalorder %v568_v15, 1  ;;  %vm2470_vm0 = vcmp.le.s32.totalorder %v568_v15, 6 }
 0x272   :  { %1846 = vmatmul.mubr.msk.f32.vlgmr.msra.gmra.mxu1 %vm372_vm7, %v371_v19  ;;  %373 = vst.msk [vmem:[#allocation8] sm:$0xff] %vm372_vm7, %v371_v19 }
 0x273   :  { %1850 = vmatprep.mubr.msk.f32.mxu1 %vm455_vm8, %v453_v20 }
 0x332   :  { %v449_v14 = vpop.f32.mrf.mxu1 }
 0x333   :  { %1848 = vmatprep.subr.mxu1 %v449_v14 }
 0x334   :  { %v1847_v22 = vpop.f32.mrf.mxu1  ;;  %1849 = vmatpush3.msra.mxu1 %v449_v14 }
 0x335   :  { %1851 = vmatmul.mubr.msk.f32.vlgmr.msra.gmra.mxu1 %vm455_vm8, %v454_v21  ;;  %1853 = vmatprep.subr.mxu1 %v809_v61  ;;  %v1719_v21 = vld [vmem:[%s2949_s8 + $0x1] ss:$0 sm:$0xff] }
 0x336   :  { %1854 = vmatpush3.msra.mxu1 %v809_v61  ;;  %v1729_v61 = vld [vmem:[%s2949_s8 + $0x6] ss:$0 sm:$0xff] }
 0x337   :  { %1855 = vmatprep.subr.mxu1 %v808_v0 }
 0x338   :  { %1856 = vmatpush3.msra.mxu1 %v808_v0 }
 0x339   :  { %1857 = vmatprep.subr.mxu1 %v807_v2 }
 0x33a   :  { %1858 = vmatpush3.msra.mxu1 %v807_v2 }
 0x33b   :  { %1859 = vmatprep.subr.mxu1 %v806_v5 }
 0x33c   :  { %1860 = vmatpush3.msra.mxu1 %v806_v5 }
 0x33d   :  { %1861 = vmatprep.subr.mxu1 %v805_v6 }
 0x33e   :  { %1862 = vmatpush3.msra.mxu1 %v805_v6 }
 0x33f   :  { %1863 = vmatprep.subr.mxu1 %v804_v8 }
 0x340   :  { %1864 = vmatpush3.msra.mxu1 %v804_v8 }
 0x341   :  { %1865 = vmatprep.subr.mxu1 %v803_v11 }
 0x342   :  { %1866 = vmatpush3.msra.mxu1 %v803_v11  ;;  %v1733_v11 = vld [vmem:[%s2949_s8 + $0x8] ss:$0 sm:$0xff] }
 0x343   :  { %1867 = vmatprep.subr.mxu1 %v802_v13 }
 0x344   :  { %1868 = vmatpush3.msra.mxu1 %v802_v13 }
 0x3f5   :  { %v1852_v25 = vpop.f32.mrf.mxu1 }
 0x3f6   :  { %v2349_v27 = vadd.f32 %v1852_v25, %v375_v24 }
 0x3f7   :  { %v528_v31 = vpop.f32.mrf.mxu1 }
 0x3f8   :  { %v2353_v32 = vadd.f32 %v528_v31, %v374_v26  ;;  %v577_v34 = vrot.slane %v2349_v27, 7  ;;  %v719_v40 = vrot.slane %v2349_v27, 1 }
 0x3fa   :  { %v576_v33 = vrot.slane %v2353_v32, 7  ;;  %v718_v39 = vrot.slane %v2353_v32, 1 }
 0x3fc   :  { %v580_v35 = vsel %vm578_vm9, %v577_v34, %v576_v33  ;;  %v579_v36 = vsel %vm578_vm9, %v576_v33, %v577_v34  ;;  %v721_v41 = vsel %vm720_vm12, %v718_v39, %v719_v40  ;;  %v722_v42 = vsel %vm720_vm12, %v719_v40, %v718_v39 }
 0x3fd   :  { %v2362_v37 = vsel %vm581_vm10, %v580_v35, 0.0  ;;  %v2364_v38 = vsel %vm582_vm11, %v579_v36, 0.0  ;;  %v2381_v43 = vsel %vm723_vm13, %v721_v41, 0.0  ;;  %v2383_v44 = vsel %vm724_vm14, %v722_v42, 0.0  ;;  %v1723_v36 = vld [vmem:[%s2949_s8 + $0x3] ss:$0 sm:$0xff] }
 0x3fe   :  { %585 = vrot.lane.b32.xlu0 %v2362_v37, %s2059_s27  ;;  %588 = vrot.lane.b32.xlu1 %v2364_v38, %s2059_s27  ;;  %v627_v31 = vmul.f32 %v1719_v21, %v2362_v37  ;;  %v628_v33 = vmul.f32 %v1719_v21, %v2364_v38 }
 0x402   :  { %652 = vrot.lane.b32.xlu0 %v2353_v32, %s2059_s27  ;;  %655 = vrot.lane.b32.xlu1 %v2349_v27, %s2059_s27 }
 0x406   :  { %727 = vrot.lane.b32.xlu0 %v2381_v43, %s2059_s27  ;;  %730 = vrot.lane.b32.xlu1 %v2383_v44, %s2059_s27 }
 0x470   :  { %v586_v45 = vpop.permute.xlu0 %585  ;;  %v589_v46 = vpop.permute.xlu1 %588 }
 0x471   :  { %v587_v47 = vsel %vm134_vm2, %v586_v45, %v2362_v37  ;;  %v590_v48 = vsel %vm134_vm2, %v589_v46, %v2364_v38 }
 0x472   :  { %591 = vrot.lane.b32.xlu0 %v587_v47, %s2059_s27  ;;  %593 = vrot.lane.b32.xlu1 %v590_v48, %s2059_s27  ;;  %v1725_v47 = vld [vmem:[%s2949_s8 + $0x4] ss:$0 sm:$0xff] }
 0x474   :  { %v653_v49 = vpop.permute.xlu0 %652  ;;  %v656_v50 = vpop.permute.xlu1 %655 }
 0x475   :  { %v654_v51 = vsel %vm134_vm2, %v653_v49, %v2353_v32  ;;  %v657_v52 = vsel %vm134_vm2, %v656_v50, %v2349_v27 }
 0x476   :  { %658 = vrot.lane.b32.xlu0 %v654_v51, %s2059_s27  ;;  %660 = vrot.lane.b32.xlu1 %v657_v52, %s2059_s27 }
 0x478   :  { %v728_v53 = vpop.permute.xlu0 %727  ;;  %v731_v54 = vpop.permute.xlu1 %730 }
 0x479   :  { %v729_v55 = vsel %vm134_vm2, %v728_v53, %v2381_v43  ;;  %v732_v56 = vsel %vm134_vm2, %v731_v54, %v2383_v44  ;;  %v1727_v54 = vld [vmem:[%s2949_s8 + $0x5] ss:$0 sm:$0xff] }
 0x47a   :  { %733 = vrot.lane.b32.xlu0 %v729_v55, %s2059_s27  ;;  %735 = vrot.lane.b32.xlu1 %v732_v56, %s2059_s27 }
 0x4e4   :  { %v592_v57 = vpop.permute.xlu0 %591  ;;  %v594_v58 = vpop.permute.xlu1 %593 }
 0x4e5   :  { %v595_v3 = vsel %vm134_vm2, %v592_v57, %v2362_v37  ;;  %v596_v4 = vsel %vm134_vm2, %v594_v58, %v2364_v38 }
 0x4e8   :  { %v659_v59 = vpop.permute.xlu0 %658  ;;  %v661_v60 = vpop.permute.xlu1 %660 }
 0x4e9   :  { %v662_v62 = vsel %vm134_vm2, %v659_v59, %v2353_v32  ;;  %v663_v63 = vsel %vm134_vm2, %v661_v60, %v2349_v27  ;;  %v694_v59 = vmul.f32 %v1725_v47, %v2353_v32  ;;  %v695_v60 = vmul.f32 %v1725_v47, %v2349_v27  ;;  %v1731_v27 = vld [vmem:[%s2949_s8 + $0x7] ss:$0 sm:$0xff]  ;;  %v993_v47 = vld [vmem:[%s2955_s14 + $0x10] sm:$0xff] }
 0x4ea   :  { %666 = vrot.lane.b32.xlu0 %v662_v62, %s2062_s26  ;;  %668 = vrot.lane.b32.xlu1 %v663_v63, %s2062_s26  ;;  %v769_v13 = vmul.f32 %v1731_v27, %v2381_v43 }
 0x4ec   :  { %v734_v9 = vpop.permute.xlu0 %733  ;;  %v736_v10 = vpop.permute.xlu1 %735 }
 0x4ed   :  { %v737_v7 = vsel %vm134_vm2, %v734_v9, %v2381_v43  ;;  %v738_v12 = vsel %vm134_vm2, %v736_v10, %v2383_v44 }
 0x4ee   :  { %600 = vrot.lane.b32.xlu0 %v595_v3, %s2062_s26  ;;  %602 = vrot.lane.b32.xlu1 %v596_v4, %s2062_s26 }
 0x4f2   :  { %632 = vrot.lane.b32.xlu0 %v595_v3, %s2061_s2  ;;  %634 = vrot.lane.b32.xlu1 %v596_v4, %s2061_s2 }
 0x4f6   :  { %698 = vrot.lane.b32.xlu0 %v662_v62, %s2061_s2  ;;  %700 = vrot.lane.b32.xlu1 %v663_v63, %s2061_s2 }
 0x4fa   :  { %741 = vrot.lane.b32.xlu0 %v737_v7, %s2062_s26  ;;  %743 = vrot.lane.b32.xlu1 %v738_v12, %s2062_s26 }
 0x4fe   :  { %773 = vrot.lane.b32.xlu0 %v737_v7, %s2061_s2  ;;  %775 = vrot.lane.b32.xlu1 %v738_v12, %s2061_s2 }
 0x55c   :  { %v667_v16 = vpop.permute.xlu0 %666  ;;  %v669_v17 = vpop.permute.xlu1 %668 }
 0x55d   :  { %v672_v39 = vsel %vm2459_vm15, %v667_v16, 0.0  ;;  %v673_v40 = vsel %vm2459_vm15, %v669_v17, 0.0  ;;  %v770_v16 = vmul.f32 %v1731_v27, %v2383_v44  ;;  %v909_v44 = vld [vmem:[%s2954_s13 + $0x18] sm:$0xff] }
 0x55e   :  { %v682_v48 = vmul.f32 %v1723_v36, %v672_v39  ;;  %v683_v49 = vmul.f32 %v1723_v36, %v673_v40  ;;  %1872 = vmatprep.subr.mxu1 %v909_v44 }
 0x560   :  { %v601_v20 = vpop.permute.xlu0 %600  ;;  %v603_v14 = vpop.permute.xlu1 %602 }
 0x561   :  { %v606_v22 = vsel %vm2459_vm15, %v601_v20, 0.0  ;;  %v607_v24 = vsel %vm2459_vm15, %v603_v14, 0.0 }
 0x562   :  { %v615_v25 = vmul.f32 %v1717_v18, %v606_v22  ;;  %v616_v26 = vmul.f32 %v1717_v18, %v607_v24  ;;  %v1734_v24 = vld [vmem:[%s2950_s9] ss:$0 sm:$0xff] }
 0x564   :  { %v633_v34 = vpop.permute.xlu0 %632  ;;  %v635_v35 = vpop.permute.xlu1 %634  ;;  %v629_v42 = vadd.f32 %v627_v31, %v615_v25  ;;  %v630_v38 = vadd.f32 %v628_v33, %v616_v26  ;;  %v907_v31 = vld [vmem:[%s2954_s13 + $0x8] sm:$0xff]  ;;  %v906_v33 = vld [vmem:[%s2954_s13] sm:$0xff] }
 0x565   :  { %v638_v41 = vsel %vm2470_vm0, %v633_v34, 0.0  ;;  %v639_v37 = vsel %vm2470_vm0, %v635_v35, 0.0  ;;  %v1735_v34 = vld [vmem:[%s2952_s11] ss:$0 sm:$0xff] }
 0x566   :  { %v648_v45 = vmul.f32 %v1721_v29, %v638_v41  ;;  %v649_v46 = vmul.f32 %v1721_v29, %v639_v37 }
 0x568   :  { %v650_v50 = vadd.f32 %v648_v45, %v629_v42  ;;  %v651_v51 = vadd.f32 %v649_v46, %v630_v38  ;;  %v699_v52 = vpop.permute.xlu0 %698  ;;  %v701_v53 = vpop.permute.xlu1 %700  ;;  %v991_v42 = vld [vmem:[%s2955_s14] sm:$0xff]  ;;  %v992_v46 = vld [vmem:[%s2955_s14 + $0x8] sm:$0xff] }
 0x569   :  { %v704_v55 = vsel %vm2470_vm0, %v699_v52, 0.0  ;;  %v705_v56 = vsel %vm2470_vm0, %v701_v53, 0.0  ;;  %1887 = vmatprep.mubr.msk.f32.mxu0 %vm995_vm1, %v991_v42 }
 0x56a   :  { %v684_v57 = vadd.f32 %v682_v48, %v650_v50  ;;  %v685_v58 = vadd.f32 %v683_v49, %v651_v51  ;;  %v714_v63 = vmul.f32 %v1727_v54, %v704_v55  ;;  %v715_v2 = vmul.f32 %v1727_v54, %v705_v56  ;;  %v994_v48 = vld [vmem:[%s2955_s14 + $0x18] sm:$0xff]  ;;  %v903_v49 = vld [vmem:[%s2953_s12 + $0x8] sm:$0xff]  ;;  %v902_v51 = vld [vmem:[%s2953_s12] sm:$0xff] }
 0x56b   :  { %v905_v54 = vld [vmem:[%s2953_s12 + $0x18] sm:$0xff]  ;;  %v1103_v56 = vand.u32 15, %v2189_v1 }
 0x56c   :  { %v696_v62 = vadd.f32 %v694_v59, %v684_v57  ;;  %v697_v0 = vadd.f32 %v695_v60, %v685_v58  ;;  %v742_v3 = vpop.permute.xlu0 %741  ;;  %v744_v4 = vpop.permute.xlu1 %743  ;;  %v904_v58 = vld [vmem:[%s2953_s12 + $0x10] sm:$0xff] }
 0x56d   :  { %v747_v5 = vsel %vm2459_vm15, %v742_v3, 0.0  ;;  %v748_v6 = vsel %vm2459_vm15, %v744_v4, 0.0  ;;  %vm1167_vm3 = vcmp.ge.s32.totalorder %v1103_v56, 1 }
 0x56e   :  { %v716_v32 = vadd.f32 %v714_v63, %v696_v62  ;;  %v717_v8 = vadd.f32 %v715_v2, %v697_v0  ;;  %v757_v9 = vmul.f32 %v1729_v61, %v747_v5  ;;  %v758_v10 = vmul.f32 %v1729_v61, %v748_v6 }
 0x56f   :  { %v1097_v63 = vadd.s32 16, %v2189_v1 }
 0x570   :  { %v759_v7 = vadd.f32 %v757_v9, %v716_v32  ;;  %v760_v12 = vadd.f32 %v758_v10, %v717_v8  ;;  %v774_v15 = vpop.permute.xlu0 %773  ;;  %v776_v17 = vpop.permute.xlu1 %775  ;;  %v1110_v32 = vand.u32 15, %v2341_v23  ;;  %v1098_v9 = vadd.s32 24, %v2189_v1 }
 0x571   :  { %v779_v18 = vsel %vm2470_vm0, %v774_v15, 0.0  ;;  %v780_v19 = vsel %vm2470_vm0, %v776_v17, 0.0  ;;  %v1117_v27 = vand.u32 15, %v1097_v63 }
 0x572   :  { %v771_v20 = vadd.f32 %v769_v13, %v759_v7  ;;  %v789_v14 = vmul.f32 %v1733_v11, %v779_v18  ;;  %v772_v21 = vadd.f32 %v770_v16, %v760_v12  ;;  %v790_v22 = vmul.f32 %v1733_v11, %v780_v19 }
 0x573   :  { %vm1169_vm4 = vcmp.ge.s32.totalorder %v1117_v27, 1  ;;  %vm1401_vm5 = vcmp.le.s32.totalorder %v1110_v32, 14  ;;  %v1124_v12 = vand.u32 15, %v1098_v9  ;;  %v1533_v27 = vld [vmem:[%s2958_s17 + $0x30] sm:$0xff] }
 0x574   :  { %v791_v25 = vadd.f32 %v789_v14, %v771_v20  ;;  %v792_v43 = vadd.f32 %v790_v22, %v772_v21 }
 0x576   :  { %v800_v26 = vadd.f32 %v1734_v24, %v791_v25  ;;  %v801_v29 = vadd.f32 %v1734_v24, %v792_v43 }
 0x578   :  { %1869 = vmatprep.mubr.msk.f32.mxu1 %vm297_vm6, %v800_v26 }
 0x579   :  { %1870 = vmatmul.mubr.msk.f32.vlgmr.msra.gmra.mxu1 %vm297_vm6, %v801_v29 }
 0x57a   :  { %1873 = vmatpush3.msra.mxu1 %v909_v44 }
 0x57b   :  { %1874 = vmatprep.subr.mxu1 %v908_v28 }
 0x57c   :  { %1875 = vmatpush3.msra.mxu1 %v908_v28 }
 0x57d   :  { %1876 = vmatprep.subr.mxu1 %v907_v31 }
 0x57e   :  { %1877 = vmatpush3.msra.mxu1 %v907_v31 }
 0x57f   :  { %1878 = vmatprep.subr.mxu1 %v906_v33 }
 0x580   :  { %1879 = vmatpush3.msra.mxu1 %v906_v33 }
 0x639   :  { %v1871_v35 = vpop.f32.mrf.mxu1 }
 0x63a   :  { %v895_v36 = vadd.f32 %v1871_v35, %v1735_v34 }
 0x63b   :  { %v889_v39 = vpop.f32.mrf.mxu1 }
 0x63c   :  { %v899_v40 = vmax.f32 %v895_v36, 0.0  ;;  %v890_v41 = vadd.f32 %v1735_v34, %v889_v39 }
 0x63e   :  { %901 = vst.msk [vmem:[#allocation9 + $0x8] sm:$0xff] %vm372_vm7, %v899_v40  ;;  %v898_v37 = vmax.f32 %v890_v41, 0.0 }
 0x640   :  { %900 = vst.msk [vmem:[#allocation9] sm:$0xff] %vm372_vm7, %v898_v37  ;;  %1880 = vmatprep.mubr.msk.f32.mxu1 %vm372_vm7, %v898_v37 }
 0x641   :  { %1881 = vmatmul.mubr.msk.f32.vlgmr.msra.gmra.mxu1 %vm372_vm7, %v899_v40  ;;  %vm1403_vm7 = vcmp.le.s32.totalorder %v1124_v12, 14  ;;  %v1529_v12 = vld [vmem:[%s2958_s17 + $0x10] sm:$0xff] }
 0x701   :  { %v1882_v38 = vpop.f32.mrf.mxu1 }
 0x702   :  { %1883 = vmatprep.subr.mxu0 %v1882_v38 }
 0x703   :  { %v982_v45 = vpop.f32.mrf.mxu1  ;;  %1884 = vmatpush3.msra.mxu0 %v1882_v38 }
 0x704   :  { %1885 = vmatprep.subr.mxu0 %v982_v45 }
 0x705   :  { %1886 = vmatpush3.msra.mxu0 %v982_v45 }
 0x706   :  { %1888 = vmatmul.mubr.msk.f32.vlgmr.msra.gmra.mxu0 %vm995_vm1, %v992_v46 }
 0x707   :  { %1890 = vmatprep.mubr.msk.f32.mxu0 %vm995_vm1, %v993_v47 }
 0x70a   :  { %1891 = vmatmul.mubr.msk.f32.gmra.mxu0 %vm995_vm1, %v994_v48 }
 0x7c6   :  { %v1889_v50 = vpop.f32.mrf.mxu0 }
 0x7c7   :  { %v2563_v52 = vadd.f32 %v1889_v50, %v903_v49 }
 0x7c8   :  { %v1074_v53 = vpop.f32.mrf.mxu0 }
 0x7c9   :  { %v2568_v55 = vadd.f32 %v1074_v53, %v902_v51  ;;  %v1160_v61 = vrot.slane %v2563_v52, 7  ;;  %v1393_v7 = vrot.slane %v2563_v52, 1 }
 0x7ca   :  { %v1892_v57 = vpop.f32.mrf.mxu0 }
 0x7cb   :  { %v2574_v59 = vadd.f32 %v1892_v57, %v905_v54  ;;  %1284 = vrot.lane.b32.xlu1 %v2568_v55, %s2059_s27  ;;  %v1159_v60 = vrot.slane %v2568_v55, 7  ;;  %v1392_v16 = vrot.slane %v2568_v55, 1 }
 0x7cc   :  { %v1084_v62 = vpop.f32.mrf.mxu0 }
 0x7cd   :  { %v2581_v0 = vadd.f32 %v1084_v62, %v904_v58  ;;  %v2585_v2 = vsel %vm578_vm9, %v1159_v60, %v1160_v61  ;;  %v1162_v3 = vrot.slane %v2574_v59, 7  ;;  %v1395_v13 = vrot.slane %v2574_v59, 1 }
 0x7ce   :  { %v2635_v20 = vsel %vm720_vm12, %v1392_v16, %v1393_v7 }
 0x7cf   :  { %1178 = vrot.lane.b32.xlu1 %v2585_v2, %s2059_s27  ;;  %v1166_v4 = vsel %vm578_vm9, %v1162_v3, %v1159_v60  ;;  %v1161_v6 = vrot.slane %v2581_v0, 7  ;;  %v1394_v8 = vrot.slane %v2581_v0, 1  ;;  %v1399_v18 = vsel %vm720_vm12, %v1395_v13, %v1392_v16 }
 0x7d0   :  { %v2592_v5 = vsel %vm1167_vm3, %v1166_v4, 0.0  ;;  %v2629_v19 = vsel %vm1403_vm7, %v1399_v18, 0.0  ;;  %v1527_v18 = vld [vmem:[%s2958_s17] sm:$0xff] }
 0x7d1   :  { %1175 = vrot.lane.b32.xlu0 %v2592_v5, %s2059_s27  ;;  %v2604_v10 = vsel %vm578_vm9, %v1161_v6, %v1162_v3  ;;  %v1164_v11 = vsel %vm578_vm9, %v1160_v61, %v1161_v6  ;;  %v1397_v23 = vsel %vm720_vm12, %v1393_v7, %v1394_v8  ;;  %v2641_v14 = vsel %vm720_vm12, %v1394_v8, %v1395_v13  ;;  %v1534_v6 = vld [vmem:[%s2958_s17 + $0x38] sm:$0xff]  ;;  %v1532_v8 = vld [vmem:[%s2958_s17 + $0x28] sm:$0xff] }
 0x7d2   :  { %v2616_v15 = vsel %vm1169_vm4, %v1164_v11, 0.0  ;;  %v2621_v17 = vsel %vm1401_vm5, %v1397_v23, 0.0  ;;  %1893 = vmatprep.subr.mxu0 %v1534_v6  ;;  %v1531_v11 = vld [vmem:[%s2958_s17 + $0x20] sm:$0xff]  ;;  %v1530_v7 = vld [vmem:[%s2958_s17 + $0x18] sm:$0xff]  ;;  %v1528_v13 = vld [vmem:[%s2958_s17 + $0x8] sm:$0xff] }
 0x7d3   :  { %1287 = vrot.lane.b32.xlu1 %v2563_v52, %s2059_s27  ;;  %1894 = vmatpush3.msra.mxu0 %v1534_v6 }
 0x7d4   :  { %1895 = vmatprep.subr.mxu0 %v1533_v27 }
 0x7d5   :  { %1184 = vrot.lane.b32.xlu0 %v2604_v10, %s2059_s27  ;;  %1896 = vmatpush3.msra.mxu0 %v1533_v27 }
 0x7d6   :  { %1897 = vmatprep.subr.mxu0 %v1532_v8 }
 0x7d7   :  { %1293 = vrot.lane.b32.xlu1 %v2574_v59, %s2059_s27  ;;  %1898 = vmatpush3.msra.mxu0 %v1532_v8 }
 0x7d8   :  { %1899 = vmatprep.subr.mxu0 %v1531_v11 }
 0x7d9   :  { %1181 = vrot.lane.b32.xlu0 %v2616_v15, %s2059_s27  ;;  %1900 = vmatpush3.msra.mxu0 %v1531_v11  ;;  %v2823_v11 = vld [vmem:[%s2956_s15 + $0x5] ss:$0 sm:$0xff] }
 0x7da   :  { %1901 = vmatprep.subr.mxu0 %v1530_v7 }
 0x7db   :  { %1411 = vrot.lane.b32.xlu1 %v2621_v17, %s2059_s27  ;;  %1902 = vmatpush3.msra.mxu0 %v1530_v7 }
 0x7dc   :  { %1903 = vmatprep.subr.mxu0 %v1529_v12 }
 0x7dd   :  { %1290 = vrot.lane.b32.xlu0 %v2581_v0, %s2059_s27  ;;  %1904 = vmatpush3.msra.mxu0 %v1529_v12 }
 0x7de   :  { %1905 = vmatprep.subr.mxu0 %v1528_v13 }
 0x7df   :  { %1417 = vrot.lane.b32.xlu1 %v2629_v19, %s2059_s27  ;;  %1906 = vmatpush3.msra.mxu0 %v1528_v13 }
 0x7e0   :  { %1907 = vmatprep.subr.mxu0 %v1527_v18 }
 0x7e1   :  { %1408 = vrot.lane.b32.xlu0 %v2635_v20, %s2059_s27  ;;  %1908 = vmatpush3.msra.mxu0 %v1527_v18 }
 0x7e5   :  { %1414 = vrot.lane.b32.xlu0 %v2641_v14, %s2059_s27 }
 0x83d   :  { %v1285_v21 = vpop.permute.xlu1 %1284 }
 0x83e   :  { %v1286_v22 = vsel %vm134_vm2, %v1285_v21, %v2568_v55 }
 0x83f   :  { %1296 = vrot.lane.b32.xlu1 %v1286_v22, %s2059_s27 }
 0x841   :  { %v1179_v24 = vpop.permute.xlu1 %1178 }
 0x842   :  { %v1180_v25 = vsel %vm134_vm2, %v1179_v24, %v2585_v2 }
 0x843   :  { %v1176_v43 = vpop.permute.xlu0 %1175  ;;  %1189 = vrot.lane.b32.xlu1 %v1180_v25, %s2059_s27 }
 0x844   :  { %v1177_v1 = vsel %vm134_vm2, %v1176_v43, %v2592_v5 }
 0x845   :  { %v1288_v26 = vpop.permute.xlu1 %1287  ;;  %1187 = vrot.lane.b32.xlu0 %v1177_v1, %s2059_s27 }
 0x846   :  { %v1289_v29 = vsel %vm134_vm2, %v1288_v26, %v2563_v52 }
 0x847   :  { %1298 = vrot.lane.b32.xlu1 %v1289_v29, %s2059_s27  ;;  %v1185_v44 = vpop.permute.xlu0 %1184 }
 0x848   :  { %v1186_v28 = vsel %vm134_vm2, %v1185_v44, %v2604_v10 }
 0x849   :  { %v1294_v31 = vpop.permute.xlu1 %1293  ;;  %1193 = vrot.lane.b32.xlu0 %v1186_v28, %s2059_s27 }
 0x84a   :  { %v1295_v33 = vsel %vm134_vm2, %v1294_v31, %v2574_v59 }
 0x84b   :  { %1302 = vrot.lane.b32.xlu1 %v1295_v33, %s2059_s27  ;;  %v1182_v34 = vpop.permute.xlu0 %1181  ;;  %v1151_v33 = vand.u32 15, %v2267_v30 }
 0x84c   :  { %v1183_v35 = vsel %vm134_vm2, %v1182_v34, %v2616_v15 }
 0x84d   :  { %v1412_v36 = vpop.permute.xlu1 %1411  ;;  %1191 = vrot.lane.b32.xlu0 %v1183_v35, %s2059_s27  ;;  %vm2786_vm8 = vcmp.le.s32.totalorder %v1151_v33, 14 }
 0x84e   :  { %v1413_v39 = vsel %vm134_vm2, %v1412_v36, %v2621_v17  ;;  %v2765_v36 = vld [vmem:[%s2956_s15] ss:$0 sm:$0xff] }
 0x84f   :  { %1422 = vrot.lane.b32.xlu1 %v1413_v39, %s2059_s27  ;;  %v1291_v40 = vpop.permute.xlu0 %1290 }
 0x850   :  { %v1292_v41 = vsel %vm134_vm2, %v1291_v40, %v2581_v0 }
 0x851   :  { %v1418_v37 = vpop.permute.xlu1 %1417  ;;  %1300 = vrot.lane.b32.xlu0 %v1292_v41, %s2059_s27  ;;  %v2774_v41 = vld [vmem:[%s2956_s15 + $0x1] ss:$0 sm:$0xff] }
 0x852   :  { %v1419_v42 = vsel %vm134_vm2, %v1418_v37, %v2629_v19 }
 0x853   :  { %1426 = vrot.lane.b32.xlu1 %v1419_v42, %s2059_s27  ;;  %v1409_v38 = vpop.permute.xlu0 %1408 }
 0x854   :  { %v1410_v45 = vsel %vm134_vm2, %v1409_v38, %v2635_v20  ;;  %v2784_v38 = vld [vmem:[%s2956_s15 + $0x2] ss:$0 sm:$0xff] }
 0x855   :  { %1420 = vrot.lane.b32.xlu0 %v1410_v45, %s2059_s27 }
 0x857   :  { %v1415_v46 = vpop.permute.xlu0 %1414 }
 0x858   :  { %v1416_v47 = vsel %vm134_vm2, %v1415_v46, %v2641_v14  ;;  %v1244_v46 = vmul.f32 %v2774_v41, %v2585_v2 }
 0x859   :  { %1424 = vrot.lane.b32.xlu0 %v1416_v47, %s2059_s27 }
 0x8b1   :  { %v1297_v48 = vpop.permute.xlu1 %1296 }
 0x8b2   :  { %v1304_v60 = vsel %vm134_vm2, %v1297_v48, %v2568_v55  ;;  %v2795_v48 = vld [vmem:[%s2956_s15 + $0x3] ss:$0 sm:$0xff] }
 0x8b5   :  { %v1190_v49 = vpop.permute.xlu1 %1189 }
 0x8b6   :  { %v1196_v4 = vsel %vm134_vm2, %v1190_v49, %v2585_v2 }
 0x8b7   :  { %v1188_v50 = vpop.permute.xlu0 %1187 }
 0x8b8   :  { %v1195_v32 = vsel %vm134_vm2, %v1188_v50, %v2592_v5 }
 0x8b9   :  { %v1299_v51 = vpop.permute.xlu1 %1298 }
 0x8ba   :  { %v1305_v53 = vsel %vm134_vm2, %v1299_v51, %v2563_v52 }
 0x8bb   :  { %1314 = vrot.lane.b32.xlu1 %v1305_v53, %s2062_s26  ;;  %v1194_v54 = vpop.permute.xlu0 %1193 }
 0x8bc   :  { %v1198_v9 = vsel %vm134_vm2, %v1194_v54, %v2604_v10 }
 0x8bd   :  { %v1303_v56 = vpop.permute.xlu1 %1302 }
 0x8be   :  { %v1307_v57 = vsel %vm134_vm2, %v1303_v56, %v2574_v59 }
 0x8bf   :  { %1362 = vrot.lane.b32.xlu1 %v1305_v53, %s2061_s2  ;;  %1318 = vrot.lane.b32.xlu0 %v1307_v57, %s2062_s26  ;;  %v1192_v58 = vpop.permute.xlu0 %1191 }
 0x8c0   :  { %v1197_v21 = vsel %vm134_vm2, %v1192_v58, %v2616_v15 }
 0x8c1   :  { %v1423_v23 = vpop.permute.xlu1 %1422 }
 0x8c2   :  { %v1429_v16 = vsel %vm134_vm2, %v1423_v23, %v2621_v17 }
 0x8c3   :  { %1312 = vrot.lane.b32.xlu1 %v1304_v60, %s2062_s26  ;;  %v1301_v61 = vpop.permute.xlu0 %1300 }
 0x8c4   :  { %v1306_v3 = vsel %vm134_vm2, %v1301_v61, %v2581_v0  ;;  %v2809_v61 = vld [vmem:[%s2956_s15 + $0x4] ss:$0 sm:$0xff] }
 0x8c5   :  { %v1427_v22 = vpop.permute.xlu1 %1426 }
 0x8c6   :  { %v1431_v25 = vsel %vm134_vm2, %v1427_v22, %v2629_v19  ;;  %v1246_v22 = vmul.f32 %v2774_v41, %v2604_v10 }
 0x8c7   :  { %1360 = vrot.lane.b32.xlu1 %v1304_v60, %s2061_s2  ;;  %v1421_v62 = vpop.permute.xlu0 %1420 }
 0x8c8   :  { %v1428_v63 = vsel %vm134_vm2, %v1421_v62, %v2635_v20 }
 0x8c9   :  { %1436 = vrot.lane.b32.xlu0 %v1428_v63, %s2062_s26 }
 0x8cb   :  { %1366 = vrot.lane.b32.xlu1 %v1307_v57, %s2061_s2  ;;  %v1425_v24 = vpop.permute.xlu0 %1424 }
 0x8cc   :  { %v1430_v43 = vsel %vm134_vm2, %v1425_v24, %v2641_v14  ;;  %vm2767_vm2 = vcmp.ge.s32.totalorder %v1151_v33, 1 }
 0x8cd   :  { %1316 = vrot.lane.b32.xlu0 %v1306_v3, %s2062_s26 }
 0x8cf   :  { %1206 = vrot.lane.b32.xlu1 %v1196_v4, %s2062_s26 }
 0x8d1   :  { %1364 = vrot.lane.b32.xlu0 %v1306_v3, %s2061_s2  ;;  %v1243_v3 = vmul.f32 %v2774_v41, %v2592_v5 }
 0x8d3   :  { %1254 = vrot.lane.b32.xlu1 %v1196_v4, %s2061_s2 }
 0x8d5   :  { %1204 = vrot.lane.b32.xlu0 %v1195_v32, %s2062_s26 }
 0x8d7   :  { %1258 = vrot.lane.b32.xlu1 %v1198_v9, %s2061_s2 }
 0x8d9   :  { %1252 = vrot.lane.b32.xlu0 %v1195_v32, %s2061_s2 }
 0x8db   :  { %1484 = vrot.lane.b32.xlu1 %v1428_v63, %s2061_s2 }
 0x8dd   :  { %1210 = vrot.lane.b32.xlu0 %v1198_v9, %s2062_s26  ;;  %v1353_v9 = vmul.f32 %v2809_v61, %v2563_v52  ;;  %v1352_v52 = vmul.f32 %v2809_v61, %v2568_v55  ;;  %v2850_v55 = vld [vmem:[%s2956_s15 + $0x7] ss:$0 sm:$0xff] }
 0x8de   :  { %v1478_v39 = vmul.f32 %v2850_v55, %v2641_v14 }
 0x8df   :  { %1438 = vrot.lane.b32.xlu1 %v1429_v16, %s2062_s26 }
 0x8e1   :  { %1208 = vrot.lane.b32.xlu0 %v1197_v21, %s2062_s26 }
 0x8e3   :  { %1486 = vrot.lane.b32.xlu1 %v1429_v16, %s2061_s2 }
 0x8e5   :  { %1256 = vrot.lane.b32.xlu0 %v1197_v21, %s2061_s2 }
 0x8e7   :  { %1490 = vrot.lane.b32.xlu1 %v1431_v25, %s2061_s2 }
 0x8e9   :  { %1440 = vrot.lane.b32.xlu0 %v1430_v43, %s2062_s26 }
 0x8ed   :  { %1442 = vrot.lane.b32.xlu0 %v1431_v25, %s2062_s26  ;;  %v2842_v25 = vld [vmem:[%s2956_s15 + $0x6] ss:$0 sm:$0xff] }
 0x8f1   :  { %1488 = vrot.lane.b32.xlu0 %v1430_v43, %s2061_s2 }
 0x92d   :  { %v1315_v1 = vpop.permute.xlu1 %1314 }
 0x92e   :  { %v1325_v49 = vsel %vm2767_vm2, %v1315_v1, 0.0 }
 0x92f   :  { %v1337_v2 = vmul.f32 %v2795_v48, %v1325_v49 }
 0x931   :  { %v1363_v26 = vpop.permute.xlu1 %1362  ;;  %v2753_v44 = vpop.permute.xlu0 %1318 }
 0x932   :  { %v1373_v7 = vsel %vm2786_vm8, %v1363_v26, 0.0  ;;  %v1327_v49 = vsel %vm2767_vm2, %v2753_v44, 0.0  ;;  %v1476_v44 = vmul.f32 %v2850_v55, %v2635_v20 }
 0x933   :  { %v1385_v24 = vmul.f32 %v2823_v11, %v1373_v7 }
 0x935   :  { %v1313_v29 = vpop.permute.xlu1 %1312 }
 0x936   :  { %v1324_v62 = vsel %vm2767_vm2, %v1313_v29, 0.0 }
 0x937   :  { %v1336_v5 = vmul.f32 %v2795_v48, %v1324_v62  ;;  %v1339_v62 = vmul.f32 %v2795_v48, %v1327_v49 }
 0x939   :  { %v1361_v28 = vpop.permute.xlu1 %1360 }
 0x93a   :  { %v1372_v23 = vsel %vm2786_vm8, %v1361_v28, 0.0 }
 0x93b   :  { %v2755_v31 = vpop.permute.xlu0 %1436  ;;  %v1384_v29 = vmul.f32 %v2823_v11, %v1372_v23 }
 0x93c   :  { %v1448_v43 = vsel %vm2767_vm2, %v2755_v31, 0.0 }
 0x93d   :  { %v2758_v34 = vpop.permute.xlu1 %1366 }
 0x93f   :  { %v2760_v35 = vpop.permute.xlu0 %1316 }
 0x941   :  { %v1207_v40 = vpop.permute.xlu1 %1206 }
 0x942   :  { %v1217_v30 = vsel %vm2767_vm2, %v1207_v40, 0.0  ;;  %v1477_v40 = vmul.f32 %v2850_v55, %v2621_v17  ;;  %v1760_v17 = vld [vmem:[%s2956_s15 + $0x8] ss:$0 sm:$0xff] }
 0x943   :  { %v1228_v37 = vmul.f32 %v2765_v36, %v1217_v30  ;;  %v2779_v42 = vpop.permute.xlu0 %1364 }
 0x945   :  { %v1255_v47 = vpop.permute.xlu1 %1254  ;;  %v1248_v51 = vadd.f32 %v1244_v46, %v1228_v37 }
 0x946   :  { %v1265_v50 = vsel %vm2786_vm8, %v1255_v47, 0.0 }
 0x947   :  { %v1277_v53 = vmul.f32 %v2784_v38, %v1265_v50  ;;  %v1205_v54 = vpop.permute.xlu0 %1204  ;;  %v1460_v50 = vmul.f32 %v2842_v25, %v1448_v43 }
 0x948   :  { %v1216_v56 = vsel %vm2767_vm2, %v1205_v54, 0.0 }
 0x949   :  { %v1281_v57 = vadd.f32 %v1277_v53, %v1248_v51  ;;  %v1227_v58 = vmul.f32 %v2765_v36, %v1216_v56  ;;  %v1259_v60 = vpop.permute.xlu1 %1258 }
 0x94a   :  { %v1267_v12 = vsel %vm2786_vm8, %v1259_v60, 0.0 }
 0x94b   :  { %v1341_v63 = vadd.f32 %v1337_v2, %v1281_v57  ;;  %v1253_v4 = vpop.permute.xlu0 %1252  ;;  %v1247_v27 = vadd.f32 %v1243_v3, %v1227_v58  ;;  %v1279_v28 = vmul.f32 %v2784_v38, %v1267_v12  ;;  %v1245_v3 = vmul.f32 %v2774_v41, %v2616_v15  ;;  %v1761_v15 = vld [vmem:[%s2957_s16] ss:$0 sm:$0xff]  ;;  %s2064_s16 = smov [#allocation9]  }
 0x94c   :  { %v1264_v6 = vsel %vm2786_vm8, %v1253_v4, 0.0  ;;  %s1662_s23 = sshll.u32 %s2064_s16, 4  ;;  %s1663_s23 = int_to_ptr.vmem [resolvable:$true] %s1662_s23 }
 0x94d   :  { %v1276_v32 = vmul.f32 %v2784_v38, %v1264_v6  ;;  %v1485_v8 = vpop.permute.xlu1 %1484  ;;  %v1357_v18 = vadd.f32 %v1353_v9, %v1341_v63  ;;  %s1988_s1 = scalar_lea.vmem %s1663_s23, 256  ;;  %p1993_p2 = scmp.lt.s32.totalorder %s1663_s23, %s1663_s23 }
 0x94e   :  { %v1496_v51 = vsel %vm2786_vm8, %v1485_v8, 0.0  ;;  %p1989_p1 = scmp.ne.s32.totalorder %s1663_s23, %s1988_s1  ;;  %p1994_p3 = scmp.lt.s32.totalorder %s1988_s1, %s1988_s1 }
 0x94f   :  { %v1280_v13 = vadd.f32 %v1276_v32, %v1247_v27  ;;  %v1211_v16 = vpop.permute.xlu0 %1210  ;;  %v1389_v37 = vadd.f32 %v1385_v24, %v1357_v18  ;;  %v1326_v27 = vsel %vm2767_vm2, %v2760_v35, 0.0  ;;  %v1375_v18 = vsel %vm2786_vm8, %v2758_v34, 0.0 }
 0x950   :  { %v1219_v21 = vsel %vm2767_vm2, %v1211_v16, 0.0  ;;  %v1338_v12 = vmul.f32 %v2795_v48, %v1326_v27  ;;  %v1355_v16 = vmul.f32 %v2809_v61, %v2574_v59  ;;  %v1387_v59 = vmul.f32 %v2823_v11, %v1375_v18  ;;  %p1995_p4 = por %p1994_p3, %p1993_p2 }
 0x951   :  { %v1340_v1 = vadd.f32 %v1336_v5, %v1280_v13  ;;  %v1230_v26 = vmul.f32 %v2765_v36, %v1219_v21  ;;  %v1439_v10 = vpop.permute.xlu1 %1438  ;;  %v1354_v21 = vmul.f32 %v2809_v61, %v2581_v0 }
 0x952   :  { %v1449_v33 = vsel %vm2767_vm2, %v1439_v10, 0.0  ;;  %p1996_p5 = pnand %p1995_p4, %p1989_p1 }
 0x953   :  { %v1356_v31 = vadd.f32 %v1352_v52, %v1340_v1  ;;  %v1250_v30 = vadd.f32 %v1246_v22, %v1230_v26  ;;  %v1461_v46 = vmul.f32 %v2842_v25, %v1449_v33  ;;  %v1209_v47 = vpop.permute.xlu0 %1208 }
 0x954   :  { %v1218_v53 = vsel %vm2767_vm2, %v1209_v47, 0.0 }
 0x955   :  { %v1388_v54 = vadd.f32 %v1384_v29, %v1356_v31  ;;  %v1283_v56 = vadd.f32 %v1279_v28, %v1250_v30  ;;  %v1465_v2 = vadd.f32 %v1461_v46, %v1389_v37  ;;  %v1229_v57 = vmul.f32 %v2765_v36, %v1218_v53  ;;  %v1487_v58 = vpop.permute.xlu1 %1486 }
 0x956   :  { %v1497_v60 = vsel %vm2786_vm8, %v1487_v58, 0.0  ;;  %v1508_v36 = vmul.f32 %v1760_v17, %v1496_v51 }
 0x957   :  { %v1464_v63 = vadd.f32 %v1460_v50, %v1388_v54  ;;  %v1481_v4 = vadd.f32 %v1477_v40, %v1465_v2  ;;  %v1257_v6 = vpop.permute.xlu0 %1256  ;;  %v1509_v32 = vmul.f32 %v1760_v17, %v1497_v60  ;;  %v1343_v9 = vadd.f32 %v1339_v62, %v1283_v56 }
 0x958   :  { %v1266_v20 = vsel %vm2786_vm8, %v1257_v6, 0.0  ;;  %v1249_v7 = vadd.f32 %v1245_v3, %v1229_v57  ;;  %v1479_v40 = vmul.f32 %v2850_v55, %v2629_v19 }
 0x959   :  { %v1480_v8 = vadd.f32 %v1476_v44, %v1464_v63  ;;  %v1278_v5 = vmul.f32 %v2784_v38, %v1266_v20  ;;  %v1513_v23 = vadd.f32 %v1509_v32, %v1481_v4  ;;  %v1374_v38 = vsel %vm2786_vm8, %v2779_v42, 0.0  ;;  %v1491_v26 = vpop.permute.xlu1 %1490 }
 0x95a   :  { %v1359_v22 = vadd.f32 %v1355_v16, %v1343_v9  ;;  %v1386_v1 = vmul.f32 %v2823_v11, %v1374_v38  ;;  %v1499_v33 = vsel %vm2786_vm8, %v1491_v26, 0.0 }
 0x95b   :  { %v1512_v41 = vadd.f32 %v1508_v36, %v1480_v8  ;;  %v1282_v13 = vadd.f32 %v1278_v5, %v1249_v7  ;;  %v1441_v35 = vpop.permute.xlu0 %1440  ;;  %v1524_v24 = vadd.f32 %v1761_v15, %v1513_v23  ;;  %v1511_v46 = vmul.f32 %v1760_v17, %v1499_v33 }
 0x95c   :  { %v1450_v43 = vsel %vm2767_vm2, %v1441_v35, 0.0  ;;  %v1391_v29 = vadd.f32 %v1387_v59, %v1359_v22 }
 0x95d   :  { %v1523_v52 = vadd.f32 %v1761_v15, %v1512_v41  ;;  %v1342_v48 = vadd.f32 %v1338_v12, %v1282_v13  ;;  %v1462_v61 = vmul.f32 %v2842_v25, %v1450_v43 }
 0x95f   :  { %v1358_v34 = vadd.f32 %v1354_v21, %v1342_v48  ;;  %1909 = vmatprep.mubr.msk.f32.mxu0 %vm297_vm6, %v1523_v52  ;;  %v1443_v10 = vpop.permute.xlu0 %1442 }
 0x960   :  { %v1451_v42 = vsel %vm2767_vm2, %v1443_v10, 0.0  ;;  %1910 = vmatmul.mubr.msk.f32.vlgmr.msra.gmra.mxu0 %vm297_vm6, %v1524_v24 }
 0x961   :  { %v1390_v0 = vadd.f32 %v1386_v1, %v1358_v34  ;;  %v1463_v28 = vmul.f32 %v2842_v25, %v1451_v42 }
 0x963   :  { %v1466_v11 = vadd.f32 %v1462_v61, %v1390_v0  ;;  %v1467_v31 = vadd.f32 %v1463_v28, %v1391_v29  ;;  %v1489_v30 = vpop.permute.xlu0 %1488 }
 0x964   :  { %v1498_v37 = vsel %vm2786_vm8, %v1489_v30, 0.0 }
 0x965   :  { %v1483_v47 = vadd.f32 %v1479_v40, %v1467_v31  ;;  %v1482_v49 = vadd.f32 %v1478_v39, %v1466_v11  ;;  %v1510_v50 = vmul.f32 %v1760_v17, %v1498_v37 }
 0x967   :  { %v1515_v25 = vadd.f32 %v1511_v46, %v1483_v47  ;;  %v1514_v51 = vadd.f32 %v1510_v50, %v1482_v49 }
 0x969   :  { %v1525_v53 = vadd.f32 %v1761_v15, %v1514_v51  ;;  %v1526_v54 = vadd.f32 %v1761_v15, %v1515_v25 }
 0x96b   :  { %1912 = vmatprep.mubr.msk.f32.mxu0 %vm297_vm6, %v1525_v53 }
 0x96c   :  { %1913 = vmatmul.mubr.msk.f32.gmra.mxu0 %vm297_vm6, %v1526_v54 }
 0x96d   :  { %1999 = shalt.err (!%p1996_p5)
}
 0x96e   :  { %s2065_s10 = smov 128   ;;  %s2066_s24 = smov 8  }
 0x96f   :  { %1668 = dma.vmem_to_hbm [thread:$0]  %s1663_s23, 256, %s2961_s20, [#allocation10], %s2065_s10, %s2065_s10, %s2066_s24  }
 0x970   :  { %s2067_s17 = smov [#allocation8]  }
 0x971   :  { %s1653_s4 = sshll.u32 %s2067_s17, 4  ;;  %s1654_s4 = int_to_ptr.vmem [resolvable:$true] %s1653_s4 }
 0x972   :  { %s2008_s2 = scalar_lea.vmem %s1654_s4, 128  ;;  %p2013_p7 = scmp.lt.s32.totalorder %s1654_s4, %s1654_s4 }
 0x973   :  { %p2009_p6 = scmp.ne.s32.totalorder %s1654_s4, %s2008_s2  ;;  %p2014_p8 = scmp.lt.s32.totalorder %s2008_s2, %s2008_s2 }
 0x975   :  { %p2015_p9 = por %p2014_p8, %p2013_p7 }
 0x977   :  { %p2016_p10 = pnand %p2015_p9, %p2009_p6 }
 0x979   :  { %2019 = shalt.err (!%p2016_p10)
}
 0x97a   :  { %1656 = dma.vmem_to_hbm [thread:$0]  %s1654_s4, 128, %s2960_s19, [#allocation4]   ;;  %v1762_v19 = vld [vmem:[%s2959_s18] ss:$0 sm:$0xff] }
 0x97b   :  { %s2068_s20 = smov [#allocation11]  }
 0x97c   :  { %s1674_s14 = sshll.u32 %s2068_s20, 4  ;;  %s1675_s14 = int_to_ptr.vmem [resolvable:$true] %s1674_s14 }
 0x97d   :  { %s2028_s18 = scalar_lea.vmem %s1675_s14, 512  ;;  %p2033_p12 = scmp.lt.s32.totalorder %s1675_s14, %s1675_s14 }
 0x97e   :  { %p2029_p11 = scmp.ne.s32.totalorder %s1675_s14, %s2028_s18  ;;  %p2034_p13 = scmp.lt.s32.totalorder %s2028_s18, %s2028_s18 }
 0x980   :  { %p2035_p0 = por %p2034_p13, %p2033_p12 }
 0x982   :  { %p2036_p1 = pnand %p2035_p0, %p2029_p11 }
 0xa20   :  { %v1911_v14 = vpop.f32.mrf.mxu0 }
 0xa21   :  { %v1626_v45 = vadd.f32 %v1911_v14, %v1762_v19 }
 0xa22   :  { %v1620_v55 = vpop.f32.mrf.mxu0 }
 0xa23   :  { %v1640_v17 = vmax.f32 %v1626_v45, 0.0  ;;  %v1621_v56 = vadd.f32 %v1762_v19, %v1620_v55 }
 0xa25   :  { %1644 = vst.msk [vmem:[#allocation11 + $0x8] sm:$0xff] %vm297_vm6, %v1640_v17  ;;  %v1639_v2 = vmax.f32 %v1621_v56, 0.0 }
 0xa27   :  { %1643 = vst.msk [vmem:[#allocation11] sm:$0xff] %vm297_vm6, %v1639_v2 }
 0xa2c   :  { %v1914_v57 = vpop.f32.mrf.mxu0 }
 0xa2d   :  { %v1636_v58 = vadd.f32 %v1914_v57, %v1762_v19 }
 0xa2e   :  { %v1630_v44 = vpop.f32.mrf.mxu0 }
 0xa2f   :  { %v1642_v60 = vmax.f32 %v1636_v58, 0.0  ;;  %v1631_v62 = vadd.f32 %v1762_v19, %v1630_v44 }
 0xa31   :  { %1646 = vst.msk [vmem:[#allocation11 + $0x18] sm:$0xff] %vm297_vm6, %v1642_v60  ;;  %v1641_v63 = vmax.f32 %v1631_v62, 0.0 }
 0xa33   :  { %1645 = vst.msk [vmem:[#allocation11 + $0x10] sm:$0xff] %vm297_vm6, %v1641_v63 }
 0xa34   :  { %2039 = shalt.err (!%p2036_p1)
}
 0xa35   :  { %1680 = dma.vmem_to_hbm [thread:$0]  %s1675_s14, 512, %s2962_s21, [#allocation10], %s2065_s10, %s2065_s10, %s2066_s24  }
 0xa36   :  { %2052 = dma.done.wait [#allocation4], 128  }
 0xa37   :  { %2053 = vsyncadd [#allocation4], 4294967168 }
 0xa38   :  { %2054 = dma.done.wait [#allocation10], 768  }
 0xa39   :  { %2055 = vsyncadd [#allocation10], 4294966528 }
 0xa3a   :  { %1690 = vsyncpa [#allocation3], 1 }
 0xa3b   :  { %1691 = vsyncpa [#allocation6], 1 }
 0xa3c   :  { %1692 = vsyncpa [#allocation4], 1 }
 0xa3d   :  { %1693 = vsyncpa [#allocation10], 1 }

</bundles_post_ra>
